<compile_context>
chip_gen: v7x
topology: tpu7x:2x2x1
jax: 0.10.0
libtpu: 0.0.40
codegen_flags: <defaults>
</compile_context>

<pallas_src>
import functools

import jax
import jax.numpy as jnp
import numpy as np
from jax import lax
from jax.experimental import pallas as pl
from jax.experimental.pallas import tpu as pltpu

EPS = 1e-5  # PyTorch nn.LayerNorm default eps


def _layernorm(x, gamma, beta):
    mu = jnp.mean(x, axis=-1, keepdims=True)
    var = jnp.mean(jnp.square(x - mu), axis=-1, keepdims=True)
    return (x - mu) * lax.rsqrt(var + EPS) * gamma + beta


def attn_block_kernel(x_ref,                      # (1, N, D) full token row of one batch element
                      g1_ref, b1_ref,             # norm_1 gamma/beta        (1, D) f32
                      wq_ref, bq_ref,             # q proj (scale folded)    (D, D) bf16 / (1, D) f32
                      wk_ref, bk_ref,             # k proj
                      wv_ref, bv_ref,             # v proj
                      wp_ref, bp_ref,             # attention output proj
                      g2_ref, b2_ref,             # norm_2 gamma/beta
                      wl_ref, bl_ref,             # lin_map
                      out_ref,                    # (1, N, D)
                      k_scr, v_scr, asum_scr,     # VMEM scratch
                      *, heads, tq, tk, exp_bf16):
    qi = pl.program_id(1)
    nq = pl.num_programs(1)
    N, D = x_ref.shape[1], x_ref.shape[2]
    hd = D // heads
    nk = N // tk

    # ---- once per batch element: LN1 over all tokens, cache K/V lane-dense in bf16 ----
    @pl.when(qi == 0)
    def _():
        xf = x_ref[0].astype(jnp.float32)                                    # (N, D)
        xn = _layernorm(xf, g1_ref[0], b1_ref[0]).astype(jnp.bfloat16)
        k = jnp.dot(xn, wk_ref[...], preferred_element_type=jnp.float32) + bk_ref[0]
        v = jnp.dot(xn, wv_ref[...], preferred_element_type=jnp.float32) + bv_ref[0]
        k_scr[...] = k.astype(jnp.bfloat16)                                  # (N, D) lane-dense
        v_scr[...] = v.astype(jnp.bfloat16)
        asum_scr[...] = jnp.zeros_like(asum_scr)

    # ---- query tile: LN1 + q projection (softmax scale already folded into wq/bq) ----
    q_start = pl.multiple_of(qi * tq, tq)
    xq = x_ref[0, pl.ds(q_start, tq), :].astype(jnp.float32)                 # (tq, D) skip tile
    xqn = _layernorm(xq, g1_ref[0], b1_ref[0]).astype(jnp.bfloat16)
    q = jnp.dot(xqn, wq_ref[...], preferred_element_type=jnp.float32) + bq_ref[0]
    q_hm = jnp.transpose(q.reshape(tq, heads, hd), (1, 0, 2)).astype(jnp.bfloat16)  # (H, tq, hd)

    # ---- flash-style attention over KV chunks (K/V resident lane-dense in VMEM) ----
    def kv_step(j, carry):
        m_i, l_i, acc = carry
        ks = pl.multiple_of(j * tk, tk)
        kb = k_scr[pl.ds(ks, tk), :]                                         # (tk, D) bf16
        vb = v_scr[pl.ds(ks, tk), :]
        # Per-chunk head split: small XLU transposes overlap with MXU work.
        kb_h = jnp.transpose(kb.reshape(tk, heads, hd), (1, 0, 2))           # (H, tk, hd)
        vb_h = jnp.transpose(vb.reshape(tk, heads, hd), (1, 0, 2))
        s = jnp.einsum('hqd,hkd->hqk', q_hm, kb_h,
                       preferred_element_type=jnp.float32)                   # (H, tq, tk)
        m_new = jnp.maximum(m_i, jnp.max(s, axis=-1, keepdims=True))
        alpha = jnp.exp(m_i - m_new)
        sub = s - m_new
        if exp_bf16:
            p = jnp.exp(sub.astype(jnp.bfloat16))                            # bf16 EUP (v6e/v7x)
        else:
            p = jnp.exp(sub).astype(jnp.bfloat16)                            # f32 EUP (v5e)
        l_new = alpha * l_i + jnp.sum(p.astype(jnp.float32), axis=-1, keepdims=True)
        acc_new = alpha * acc + jnp.einsum('hqk,hkd->hqd', p, vb_h,
                                           preferred_element_type=jnp.float32)
        return m_new, l_new, acc_new

    m0 = jnp.full((heads, tq, 1), -jnp.inf, jnp.float32)
    l0 = jnp.zeros((heads, tq, 1), jnp.float32)
    a0 = jnp.zeros((heads, tq, hd), jnp.float32)
    _, l_i, acc = lax.fori_loop(0, nk, kv_step, (m0, l0, a0))

    o = acc * pl.reciprocal(l_i, approx=True)                                # (H, tq, hd) f32
    o = jnp.transpose(o, (1, 0, 2)).reshape(tq, D).astype(jnp.bfloat16)      # (tq, D)
    attn = jnp.dot(o, wp_ref[...], preferred_element_type=jnp.float32) + bp_ref[0]

    # ---- skip connection (static branch mirroring `if attn.shape[1] > 128`) ----
    if N > 128:
        # Token mean is a cross-tile reduction: accumulate, finalize on last tile.
        asum_scr[...] += jnp.sum(attn, axis=0, keepdims=True)

        @pl.when(qi == nq - 1)
        def _():
            mean = asum_scr[...] * (1.0 / N)                                 # (1, D) f32

            # Chunked finalize: stream tq-row blocks instead of one (N, D) slab.
            def finalize_block(r, carry):
                rs = pl.multiple_of(r * tq, tq)
                skip = x_ref[0, pl.ds(rs, tq), :].astype(jnp.float32)        # (tq, D)
                latent = mean + skip
                ln2 = _layernorm(latent, g2_ref[0], b2_ref[0]).astype(jnp.bfloat16)
                out = latent + jnp.dot(ln2, wl_ref[...],
                                       preferred_element_type=jnp.float32) + bl_ref[0]
                out_ref[0, pl.ds(rs, tq), :] = out.astype(out_ref.dtype)
                return carry

            lax.fori_loop(0, nq, finalize_block, 0)
    else:
        latent = attn + xq
        ln2 = _layernorm(latent, g2_ref[0], b2_ref[0]).astype(jnp.bfloat16)
        out = latent + jnp.dot(ln2, wl_ref[...],
                               preferred_element_type=jnp.float32) + bl_ref[0]
        out_ref[0, pl.ds(q_start, tq), :] = out.astype(out_ref.dtype)


def _pick_query_tile(n, cap=256):
    if n <= cap:
        return n
    t = cap
    while t >= 8 and n % t:
        t //= 2
    return t if (t >= 8 and n % t == 0) else n


def _pick_kv_tile(n, cap=512):
    # Single KV pass (no online-softmax rescale) for moderate N; else the largest
    # power-of-two divisor <= cap.
    if n <= cap:
        return n
    t = cap
    while t >= 128 and n % t:
        t //= 2
    return t if n % t == 0 else n


def _chip_tuning():
    """Returns (use bf16 exp?, vmem_limit_bytes) by TPU generation."""
    try:
        kind = jax.devices()[0].device_kind.lower()
    except Exception:
        kind = ""
    if "v7" in kind:
        return True, 56 * 1024 * 1024     # 64 MiB physical per TC: leave headroom
    if "v6" in kind:
        return True, 100 * 1024 * 1024    # 128 MiB physical, bf16 EUP available
    if "v5" in kind:
        return False, 100 * 1024 * 1024   # 128 MiB physical, no bf16 EUP
    return False, 64 * 1024 * 1024


def attn_block(x, q_global, params, *, heads, kv_tile=None):
    # TODO(synk): `attn_type` is dependency-injected in the PyTorch module; a standard
    # global multi-head self-attention is implemented here, so `q_global` is accepted
    # for API parity but never passed to (or DMA'd into) the kernel.
    del q_global
    (g1, b1, wqkv, bqkv, wproj, bproj, g2, b2, wlin, blin) = params
    B, N, D = x.shape
    assert D % heads == 0
    hd = D // heads
    scale = hd ** -0.5

    # Split fused qkv weights; fold the softmax scale into the q projection (free,
    # wrapper-side); keep MXU operands in bf16 (f32 accumulation inside the kernel).
    wq, wk, wv = jnp.split(wqkv, 3, axis=1)
    bq, bk, bv = jnp.split(bqkv, 3, axis=1)
    wq = (wq * scale).astype(jnp.bfloat16)
    bq = bq * scale
    wk_b = wk.astype(jnp.bfloat16)
    wv_b = wv.astype(jnp.bfloat16)
    wp_b = wproj.astype(jnp.bfloat16)
    wl_b = wlin.astype(jnp.bfloat16)

    tq = _pick_query_tile(N)
    tk = kv_tile if kv_tile is not None else _pick_kv_tile(N)
    # TODO(synk): pad/mask ragged N instead of requiring exact divisibility.
    assert N % tq == 0 and N % tk == 0
    nq = N // tq

    exp_bf16, vmem_limit = _chip_tuning()

    kernel = functools.partial(attn_block_kernel, heads=heads, tq=tq, tk=tk,
                               exp_bf16=exp_bf16)

    def wspec(shape):
        # Constant block index across the whole grid -> single-buffer: no prefetch
        # benefit, and default double-buffering would cost 2x weight VMEM.
        return pl.BlockSpec(shape, lambda b, q: (0,) * len(shape),
                            pipeline_mode=pl.Buffered(1))

    row_spec = pl.BlockSpec((1, N, D), lambda b, q: (b, 0, 0))

    # TODO(synk): for B < num-cores on v7x, split the query axis across TensorCores
    # with per-core partial asum scratch + combine instead of batch-only parallelism.
    return pl.pallas_call(
        kernel,
        out_shape=jax.ShapeDtypeStruct((B, N, D), x.dtype),
        grid=(B, nq),
        in_specs=[
            row_spec,                         # x (full token row per batch element)
            wspec((1, D)), wspec((1, D)),     # norm_1 gamma, beta
            wspec((D, D)), wspec((1, D)),     # q proj (scale folded), bias
            wspec((D, D)), wspec((1, D)),     # k proj, bias
            wspec((D, D)), wspec((1, D)),     # v proj, bias
            wspec((D, D)), wspec((1, D)),     # attn output proj, bias
            wspec((1, D)), wspec((1, D)),     # norm_2 gamma, beta
            wspec((D, D)), wspec((1, D)),     # lin_map weight, bias
        ],
        out_specs=row_spec,
        scratch_shapes=[
            pltpu.VMEM((N, D), jnp.bfloat16),   # K cache (lane-dense)
            pltpu.VMEM((N, D), jnp.bfloat16),   # V cache (lane-dense)
            pltpu.VMEM((1, D), jnp.float32),    # attn token-sum (mean branch)
        ],
        compiler_params=pltpu.CompilerParams(
            dimension_semantics=("parallel", "arbitrary"),
            vmem_limit_bytes=vmem_limit,
        ),
    )(x, g1, b1, wq, bq, wk_b, bk, wv_b, bv, wp_b, bproj, g2, b2, wl_b, blin)


# ---------------- pure-JAX reference (same math, f32, no Pallas) ----------------
def attn_block_ref(x, q_global, params, *, heads):
    (g1, b1, wqkv, bqkv, wproj, bproj, g2, b2, wlin, blin) = params
    B, N, D = x.shape
    hd = D // heads
    scale = hd ** -0.5

    skip = x
    xn = _layernorm(x, g1[0], b1[0])
    qkv = xn @ wqkv + bqkv[0]
    qkv = qkv.reshape(B, N, 3, heads, hd).transpose(2, 0, 3, 1, 4)  # (3,B,H,N,hd)
    q, k, v = qkv[0], qkv[1], qkv[2]
    s = jnp.einsum('bhnd,bhmd->bhnm', q, k) * scale
    p = jax.nn.softmax(s, axis=-1)
    o = jnp.einsum('bhnm,bhmd->bhnd', p, v).transpose(0, 2, 1, 3).reshape(B, N, D)
    attn = o @ wproj + bproj[0]
    if attn.shape[1] > 128:
        latent = jnp.mean(attn, axis=1, keepdims=True) + skip
    else:
        latent = attn + skip
    ln2 = _layernorm(latent, g2[0], b2[0])
    return latent + ln2 @ wlin + blin[0]


def init_params(key, dim):
    ks = jax.random.split(key, 4)
    g1 = jnp.ones((1, dim), jnp.float32)
    b1 = jnp.zeros((1, dim), jnp.float32)
    wqkv = 0.05 * jax.random.normal(ks[0], (dim, 3 * dim), jnp.float32)
    bqkv = 0.01 * jax.random.normal(ks[1], (1, 3 * dim), jnp.float32)
    wproj = 0.05 * jax.random.normal(ks[2], (dim, dim), jnp.float32)
    bproj = jnp.zeros((1, dim), jnp.float32)
    g2 = jnp.ones((1, dim), jnp.float32)
    b2 = jnp.zeros((1, dim), jnp.float32)
    wlin = 0.05 * jax.random.normal(ks[3], (dim, dim), jnp.float32)
    blin = jnp.zeros((1, dim), jnp.float32)
    return (g1, b1, wqkv, bqkv, wproj, bproj, g2, b2, wlin, blin)


if __name__ == "__main__":
    k1, k2, k3, k4, k5 = jax.random.split(jax.random.PRNGKey(0), 5)

    # Case 1: per-token skip path (N <= 128), tiny shapes.
    B, N, D, H = 2, 8, 32, 4
    x = jax.random.normal(k1, (B, N, D), jnp.float32)
    q_global = jax.random.normal(k2, (B, N, D), jnp.float32)
    params = init_params(k3, D)
    out = jax.block_until_ready(attn_block(x, q_global, params, heads=H))
    ref = attn_block_ref(x, q_global, params, heads=H)
    # bf16 matmul operands + (chip-gated) bf16 exp + approx reciprocal => relaxed tol.
    np.testing.assert_allclose(np.asarray(out), np.asarray(ref), rtol=2e-2, atol=2e-2)

    # Case 2: token-mean skip path (N > 128), exercises query tiling (nq > 1),
    # multi-chunk online softmax (kv_tile=128 -> nk=4), per-chunk head split,
    # the cross-tile attn-mean accumulation and the chunked finalize.
    B2, N2, D2, H2 = 1, 512, 128, 4
    x2 = jax.random.normal(k4, (B2, N2, D2), jnp.float32)
    q2 = jnp.zeros_like(x2)
    params2 = init_params(k5, D2)
    out2 = jax.block_until_ready(attn_block(x2, q2, params2, heads=H2, kv_tile=128))
    ref2 = attn_block_ref(x2, q2, params2, heads=H2)
    np.testing.assert_allclose(np.asarray(out2), np.asarray(ref2), rtol=2e-2, atol=2e-2)

    print("KERNEL_OK")
</pallas_src>

<mosaic_0001>
module attributes {stable_mosaic.version = 11 : i64} {
  func.func @attn_block_kernel(%arg0: i32, %arg1: i32, %arg2: memref<1x8x32xf32, #tpu.memory_space<vmem>>, %arg3: memref<1x32xf32, #tpu.memory_space<vmem>>, %arg4: memref<1x32xf32, #tpu.memory_space<vmem>>, %arg5: memref<32x32xbf16, #tpu.memory_space<vmem>>, %arg6: memref<1x32xf32, #tpu.memory_space<vmem>>, %arg7: memref<32x32xbf16, #tpu.memory_space<vmem>>, %arg8: memref<1x32xf32, #tpu.memory_space<vmem>>, %arg9: memref<32x32xbf16, #tpu.memory_space<vmem>>, %arg10: memref<1x32xf32, #tpu.memory_space<vmem>>, %arg11: memref<32x32xbf16, #tpu.memory_space<vmem>>, %arg12: memref<1x32xf32, #tpu.memory_space<vmem>>, %arg13: memref<1x32xf32, #tpu.memory_space<vmem>>, %arg14: memref<1x32xf32, #tpu.memory_space<vmem>>, %arg15: memref<32x32xbf16, #tpu.memory_space<vmem>>, %arg16: memref<1x32xf32, #tpu.memory_space<vmem>>, %arg17: memref<1x8x32xf32, #tpu.memory_space<vmem>>, %arg18: memref<8x32xbf16, #tpu.memory_space<vmem>>, %arg19: memref<8x32xbf16, #tpu.memory_space<vmem>>, %arg20: memref<1x32xf32, #tpu.memory_space<vmem>>) attributes {dimension_semantics = [#tpu.dimension_semantics<parallel>, #tpu.dimension_semantics<arbitrary>], iteration_bounds = array<i64: 2, 1>, scalar_prefetch = 0 : i64, scratch_operands = 3 : i64, tpu.core_type = #tpu.core_type<tc>, window_params = [{transform_indices = @transform_0, window_bounds = array<i64: 1, 8, 32>}, {pipeline_mode = #tpu.pipeline_mode<synchronous>, transform_indices = @transform_1, window_bounds = array<i64: 1, 32>}, {pipeline_mode = #tpu.pipeline_mode<synchronous>, transform_indices = @transform_2, window_bounds = array<i64: 1, 32>}, {pipeline_mode = #tpu.pipeline_mode<synchronous>, transform_indices = @transform_3, window_bounds = array<i64: 32, 32>}, {pipeline_mode = #tpu.pipeline_mode<synchronous>, transform_indices = @transform_4, window_bounds = array<i64: 1, 32>}, {pipeline_mode = #tpu.pipeline_mode<synchronous>, transform_indices = @transform_5, window_bounds = array<i64: 32, 32>}, {pipeline_mode = #tpu.pipeline_mode<synchronous>, transform_indices = @transform_6, window_bounds = array<i64: 1, 32>}, {pipeline_mode = #tpu.pipeline_mode<synchronous>, transform_indices = @transform_7, window_bounds = array<i64: 32, 32>}, {pipeline_mode = #tpu.pipeline_mode<synchronous>, transform_indices = @transform_8, window_bounds = array<i64: 1, 32>}, {pipeline_mode = #tpu.pipeline_mode<synchronous>, transform_indices = @transform_9, window_bounds = array<i64: 32, 32>}, {pipeline_mode = #tpu.pipeline_mode<synchronous>, transform_indices = @transform_10, window_bounds = array<i64: 1, 32>}, {pipeline_mode = #tpu.pipeline_mode<synchronous>, transform_indices = @transform_11, window_bounds = array<i64: 1, 32>}, {pipeline_mode = #tpu.pipeline_mode<synchronous>, transform_indices = @transform_12, window_bounds = array<i64: 1, 32>}, {pipeline_mode = #tpu.pipeline_mode<synchronous>, transform_indices = @transform_13, window_bounds = array<i64: 32, 32>}, {pipeline_mode = #tpu.pipeline_mode<synchronous>, transform_indices = @transform_14, window_bounds = array<i64: 1, 32>}, {transform_indices = @transform_15, window_bounds = array<i64: 1, 8, 32>}]} {
    %c0_i32 = arith.constant 0 : i32
    %0 = arith.cmpi eq, %arg1, %c0_i32 : i32
    %1 = arith.extui %0 : i1 to i32
    %c0_i32_0 = arith.constant 0 : i32
    %2 = arith.cmpi ne, %1, %c0_i32_0 : i32
    scf.if %2 {
      %c0_47 = arith.constant 0 : index
      %c0_48 = arith.constant 0 : index
      %c0_49 = arith.constant 0 : index
      %134 = vector.load %arg2[%c0_47, %c0_48, %c0_49] : memref<1x8x32xf32, #tpu.memory_space<vmem>>, vector<1x8x32xf32>
      %135 = vector.shape_cast %134 : vector<1x8x32xf32> to vector<8x32xf32>
      %c0_50 = arith.constant 0 : index
      %c0_51 = arith.constant 0 : index
      %136 = vector.load %arg3[%c0_50, %c0_51] : memref<1x32xf32, #tpu.memory_space<vmem>>, vector<1x32xf32>
      %137 = vector.shape_cast %136 : vector<1x32xf32> to vector<32xf32>
      %c0_52 = arith.constant 0 : index
      %c0_53 = arith.constant 0 : index
      %138 = vector.load %arg4[%c0_52, %c0_53] : memref<1x32xf32, #tpu.memory_space<vmem>>, vector<1x32xf32>
      %139 = vector.shape_cast %138 : vector<1x32xf32> to vector<32xf32>
      %cst_54 = arith.constant dense<0.000000e+00> : vector<8xf32>
      %140 = vector.multi_reduction <add>, %135, %cst_54 [1] : vector<8x32xf32> to vector<8xf32>
      %141 = vector.shape_cast %140 : vector<8xf32> to vector<8x1xf32>
      %cst_55 = arith.constant 3.200000e+01 : f32
      %142 = vector.broadcast %cst_55 : f32 to vector<8x1xf32>
      %143 = arith.divf %141, %142 : vector<8x1xf32>
      %144 = vector.broadcast %143 : vector<8x1xf32> to vector<8x32xf32>
      %145 = arith.subf %135, %144 : vector<8x32xf32>
      %146 = arith.mulf %145, %145 : vector<8x32xf32>
      %cst_56 = arith.constant dense<0.000000e+00> : vector<8xf32>
      %147 = vector.multi_reduction <add>, %146, %cst_56 [1] : vector<8x32xf32> to vector<8xf32>
      %148 = vector.shape_cast %147 : vector<8xf32> to vector<8x1xf32>
      %cst_57 = arith.constant 3.200000e+01 : f32
      %149 = vector.broadcast %cst_57 : f32 to vector<8x1xf32>
      %150 = arith.divf %148, %149 : vector<8x1xf32>
      %151 = vector.broadcast %143 : vector<8x1xf32> to vector<8x32xf32>
      %152 = arith.subf %135, %151 : vector<8x32xf32>
      %cst_58 = arith.constant 9.99999974E-6 : f32
      %153 = vector.broadcast %cst_58 : f32 to vector<8x1xf32>
      %154 = arith.addf %150, %153 : vector<8x1xf32>
      %155 = math.rsqrt %154 : vector<8x1xf32>
      %156 = vector.broadcast %155 : vector<8x1xf32> to vector<8x32xf32>
      %157 = arith.mulf %152, %156 : vector<8x32xf32>
      %158 = vector.shape_cast %137 : vector<32xf32> to vector<1x32xf32>
      %159 = vector.broadcast %158 : vector<1x32xf32> to vector<8x32xf32>
      %160 = arith.mulf %157, %159 : vector<8x32xf32>
      %161 = vector.shape_cast %139 : vector<32xf32> to vector<1x32xf32>
      %162 = vector.broadcast %161 : vector<1x32xf32> to vector<8x32xf32>
      %163 = arith.addf %160, %162 : vector<8x32xf32>
      %164 = arith.truncf %163 : vector<8x32xf32> to vector<8x32xbf16>
      %c0_59 = arith.constant 0 : index
      %c0_60 = arith.constant 0 : index
      %165 = vector.load %arg7[%c0_59, %c0_60] : memref<32x32xbf16, #tpu.memory_space<vmem>>, vector<32x32xbf16>
      %cst_61 = arith.constant dense<0.000000e+00> : vector<8x32xf32>
      %166 = tpu.matmul %164, %165, %cst_61 {dimension_numbers = #tpu.dot_dimension_numbers<[1], [0], [0], [1], [0, 0, 1, 1], [], []>} : vector<8x32xbf16>, vector<32x32xbf16>, vector<8x32xf32> -> vector<8x32xf32>
      %c0_62 = arith.constant 0 : index
      %c0_63 = arith.constant 0 : index
      %167 = vector.load %arg8[%c0_62, %c0_63] : memref<1x32xf32, #tpu.memory_space<vmem>>, vector<1x32xf32>
      %168 = vector.shape_cast %167 : vector<1x32xf32> to vector<32xf32>
      %169 = vector.shape_cast %168 : vector<32xf32> to vector<1x32xf32>
      %170 = vector.broadcast %169 : vector<1x32xf32> to vector<8x32xf32>
      %171 = arith.addf %166, %170 : vector<8x32xf32>
      %c0_64 = arith.constant 0 : index
      %c0_65 = arith.constant 0 : index
      %172 = vector.load %arg9[%c0_64, %c0_65] : memref<32x32xbf16, #tpu.memory_space<vmem>>, vector<32x32xbf16>
      %cst_66 = arith.constant dense<0.000000e+00> : vector<8x32xf32>
      %173 = tpu.matmul %164, %172, %cst_66 {dimension_numbers = #tpu.dot_dimension_numbers<[1], [0], [0], [1], [0, 0, 1, 1], [], []>} : vector<8x32xbf16>, vector<32x32xbf16>, vector<8x32xf32> -> vector<8x32xf32>
      %c0_67 = arith.constant 0 : index
      %c0_68 = arith.constant 0 : index
      %174 = vector.load %arg10[%c0_67, %c0_68] : memref<1x32xf32, #tpu.memory_space<vmem>>, vector<1x32xf32>
      %175 = vector.shape_cast %174 : vector<1x32xf32> to vector<32xf32>
      %176 = vector.shape_cast %175 : vector<32xf32> to vector<1x32xf32>
      %177 = vector.broadcast %176 : vector<1x32xf32> to vector<8x32xf32>
      %178 = arith.addf %173, %177 : vector<8x32xf32>
      %179 = arith.truncf %171 : vector<8x32xf32> to vector<8x32xbf16>
      %c0_69 = arith.constant 0 : index
      %c0_70 = arith.constant 0 : index
      %180 = vector.load %arg18[%c0_69, %c0_70] : memref<8x32xbf16, #tpu.memory_space<vmem>>, vector<8x32xbf16>
      tpu.vector_store %arg18[%c0_69, %c0_70], %179 {strides = array<i32>} : memref<8x32xbf16, #tpu.memory_space<vmem>>, vector<8x32xbf16>,
      %181 = arith.truncf %178 : vector<8x32xf32> to vector<8x32xbf16>
      %c0_71 = arith.constant 0 : index
      %c0_72 = arith.constant 0 : index
      %182 = vector.load %arg19[%c0_71, %c0_72] : memref<8x32xbf16, #tpu.memory_space<vmem>>, vector<8x32xbf16>
      tpu.vector_store %arg19[%c0_71, %c0_72], %181 {strides = array<i32>} : memref<8x32xbf16, #tpu.memory_space<vmem>>, vector<8x32xbf16>,
      %cst_73 = arith.constant 0.000000e+00 : f32
      %183 = vector.broadcast %cst_73 : f32 to vector<1x32xf32>
      %c0_74 = arith.constant 0 : index
      %c0_75 = arith.constant 0 : index
      %184 = vector.load %arg20[%c0_74, %c0_75] : memref<1x32xf32, #tpu.memory_space<vmem>>, vector<1x32xf32>
      tpu.vector_store %arg20[%c0_74, %c0_75], %183 {strides = array<i32>} : memref<1x32xf32, #tpu.memory_space<vmem>>, vector<1x32xf32>,
    } else {
    }
    %c8_i32 = arith.constant 8 : i32
    %3 = arith.muli %arg1, %c8_i32 : i32
    %4 = tpu.assume_multiple %3, 8 : i32
    %c0 = arith.constant 0 : index
    %5 = arith.index_cast %4 : i32 to index
    %c0_1 = arith.constant 0 : index
    %6 = vector.load %arg2[%c0, %5, %c0_1] : memref<1x8x32xf32, #tpu.memory_space<vmem>>, vector<1x8x32xf32>
    %7 = vector.shape_cast %6 : vector<1x8x32xf32> to vector<8x32xf32>
    %c0_2 = arith.constant 0 : index
    %c0_3 = arith.constant 0 : index
    %8 = vector.load %arg3[%c0_2, %c0_3] : memref<1x32xf32, #tpu.memory_space<vmem>>, vector<1x32xf32>
    %9 = vector.shape_cast %8 : vector<1x32xf32> to vector<32xf32>
    %c0_4 = arith.constant 0 : index
    %c0_5 = arith.constant 0 : index
    %10 = vector.load %arg4[%c0_4, %c0_5] : memref<1x32xf32, #tpu.memory_space<vmem>>, vector<1x32xf32>
    %11 = vector.shape_cast %10 : vector<1x32xf32> to vector<32xf32>
    %cst = arith.constant dense<0.000000e+00> : vector<8xf32>
    %12 = vector.multi_reduction <add>, %7, %cst [1] : vector<8x32xf32> to vector<8xf32>
    %13 = vector.shape_cast %12 : vector<8xf32> to vector<8x1xf32>
    %cst_6 = arith.constant 3.200000e+01 : f32
    %14 = vector.broadcast %cst_6 : f32 to vector<8x1xf32>
    %15 = arith.divf %13, %14 : vector<8x1xf32>
    %16 = vector.broadcast %15 : vector<8x1xf32> to vector<8x32xf32>
    %17 = arith.subf %7, %16 : vector<8x32xf32>
    %18 = arith.mulf %17, %17 : vector<8x32xf32>
    %cst_7 = arith.constant dense<0.000000e+00> : vector<8xf32>
    %19 = vector.multi_reduction <add>, %18, %cst_7 [1] : vector<8x32xf32> to vector<8xf32>
    %20 = vector.shape_cast %19 : vector<8xf32> to vector<8x1xf32>
    %cst_8 = arith.constant 3.200000e+01 : f32
    %21 = vector.broadcast %cst_8 : f32 to vector<8x1xf32>
    %22 = arith.divf %20, %21 : vector<8x1xf32>
    %23 = vector.broadcast %15 : vector<8x1xf32> to vector<8x32xf32>
    %24 = arith.subf %7, %23 : vector<8x32xf32>
    %cst_9 = arith.constant 9.99999974E-6 : f32
    %25 = vector.broadcast %cst_9 : f32 to vector<8x1xf32>
    %26 = arith.addf %22, %25 : vector<8x1xf32>
    %27 = math.rsqrt %26 : vector<8x1xf32>
    %28 = vector.broadcast %27 : vector<8x1xf32> to vector<8x32xf32>
    %29 = arith.mulf %24, %28 : vector<8x32xf32>
    %30 = vector.shape_cast %9 : vector<32xf32> to vector<1x32xf32>
    %31 = vector.broadcast %30 : vector<1x32xf32> to vector<8x32xf32>
    %32 = arith.mulf %29, %31 : vector<8x32xf32>
    %33 = vector.shape_cast %11 : vector<32xf32> to vector<1x32xf32>
    %34 = vector.broadcast %33 : vector<1x32xf32> to vector<8x32xf32>
    %35 = arith.addf %32, %34 : vector<8x32xf32>
    %36 = arith.truncf %35 : vector<8x32xf32> to vector<8x32xbf16>
    %c0_10 = arith.constant 0 : index
    %c0_11 = arith.constant 0 : index
    %37 = vector.load %arg5[%c0_10, %c0_11] : memref<32x32xbf16, #tpu.memory_space<vmem>>, vector<32x32xbf16>
    %cst_12 = arith.constant dense<0.000000e+00> : vector<8x32xf32>
    %38 = tpu.matmul %36, %37, %cst_12 {dimension_numbers = #tpu.dot_dimension_numbers<[1], [0], [0], [1], [0, 0, 1, 1], [], []>} : vector<8x32xbf16>, vector<32x32xbf16>, vector<8x32xf32> -> vector<8x32xf32>
    %c0_13 = arith.constant 0 : index
    %c0_14 = arith.constant 0 : index
    %39 = vector.load %arg6[%c0_13, %c0_14] : memref<1x32xf32, #tpu.memory_space<vmem>>, vector<1x32xf32>
    %40 = vector.shape_cast %39 : vector<1x32xf32> to vector<32xf32>
    %41 = vector.shape_cast %40 : vector<32xf32> to vector<1x32xf32>
    %42 = vector.broadcast %41 : vector<1x32xf32> to vector<8x32xf32>
    %43 = arith.addf %38, %42 : vector<8x32xf32>
    %44 = vector.shape_cast %43 : vector<8x32xf32> to vector<8x4x8xf32>
    %45 = tpu.transpose %44, [1, 0, 2] : vector<8x4x8xf32> -> vector<4x8x8xf32>
    %46 = arith.truncf %45 : vector<4x8x8xf32> to vector<4x8x8xbf16>
    %cst_15 = arith.constant 0xFF800000 : f32
    %47 = vector.broadcast %cst_15 : f32 to vector<4x8x1xf32>
    %cst_16 = arith.constant 0.000000e+00 : f32
    %48 = vector.broadcast %cst_16 : f32 to vector<4x8x1xf32>
    %cst_17 = arith.constant 0.000000e+00 : f32
    %49 = vector.broadcast %cst_17 : f32 to vector<4x8x8xf32>
    %c0_i32_18 = arith.constant 0 : i32
    %c8_i32_19 = arith.constant 8 : i32
    %50 = arith.muli %c0_i32_18, %c8_i32_19 : i32
    %51 = tpu.assume_multiple %50, 8 : i32
    %52 = arith.index_cast %51 : i32 to index
    %c0_20 = arith.constant 0 : index
    %53 = vector.load %arg18[%52, %c0_20] : memref<8x32xbf16, #tpu.memory_space<vmem>>, vector<8x32xbf16>
    %54 = arith.index_cast %51 : i32 to index
    %c0_21 = arith.constant 0 : index
    %55 = vector.load %arg19[%54, %c0_21] : memref<8x32xbf16, #tpu.memory_space<vmem>>, vector<8x32xbf16>
    %56 = vector.shape_cast %53 : vector<8x32xbf16> to vector<8x4x8xbf16>
    %57 = tpu.transpose %56, [1, 0, 2] : vector<8x4x8xbf16> -> vector<4x8x8xbf16>
    %58 = vector.shape_cast %55 : vector<8x32xbf16> to vector<8x4x8xbf16>
    %59 = tpu.transpose %58, [1, 0, 2] : vector<8x4x8xbf16> -> vector<4x8x8xbf16>
    "tpu.trace_start"() <{level = 10 : i32, message = "hqd,hkd->hqk"}> : () -> ()
    %cst_22 = arith.constant dense<0.000000e+00> : vector<4x8x8xf32>
    %60 = tpu.matmul %46, %57, %cst_22 {dimension_numbers = #tpu.dot_dimension_numbers<[2], [2], [1], [1], [0, 0, 0, 1, 1, 1], [0], [0]>} : vector<4x8x8xbf16>, vector<4x8x8xbf16>, vector<4x8x8xf32> -> vector<4x8x8xf32>
    "tpu.trace_stop"() : () -> ()
    %cst_23 = arith.constant dense<0xFF800000> : vector<4x8xf32>
    %61 = vector.multi_reduction <maximumf>, %60, %cst_23 [2] : vector<4x8x8xf32> to vector<4x8xf32>
    %62 = vector.shape_cast %61 : vector<4x8xf32> to vector<4x8x1xf32>
    %63 = arith.maximumf %47, %62 : vector<4x8x1xf32>
    %64 = arith.subf %47, %63 : vector<4x8x1xf32>
    %65 = math.exp %64 : vector<4x8x1xf32>
    %66 = vector.broadcast %63 : vector<4x8x1xf32> to vector<4x8x8xf32>
    %67 = arith.subf %60, %66 : vector<4x8x8xf32>
    %68 = math.exp %67 : vector<4x8x8xf32>
    %69 = arith.truncf %68 : vector<4x8x8xf32> to vector<4x8x8xbf16>
    %70 = arith.mulf %65, %48 : vector<4x8x1xf32>
    %71 = arith.extf %69 : vector<4x8x8xbf16> to vector<4x8x8xf32>
    %cst_24 = arith.constant dense<0.000000e+00> : vector<4x8xf32>
    %72 = vector.multi_reduction <add>, %71, %cst_24 [2] : vector<4x8x8xf32> to vector<4x8xf32>
    %73 = vector.shape_cast %72 : vector<4x8xf32> to vector<4x8x1xf32>
    %74 = arith.addf %70, %73 : vector<4x8x1xf32>
    %75 = vector.broadcast %65 : vector<4x8x1xf32> to vector<4x8x8xf32>
    %76 = arith.mulf %75, %49 : vector<4x8x8xf32>
    "tpu.trace_start"() <{level = 10 : i32, message = "hqk,hkd->hqd"}> : () -> ()
    %cst_25 = arith.constant dense<0.000000e+00> : vector<4x8x8xf32>
    %77 = tpu.matmul %69, %59, %cst_25 {dimension_numbers = #tpu.dot_dimension_numbers<[2], [1], [1], [2], [0, 0, 0, 1, 1, 2], [0], [0]>} : vector<4x8x8xbf16>, vector<4x8x8xbf16>, vector<4x8x8xf32> -> vector<4x8x8xf32>
    "tpu.trace_stop"() : () -> ()
    %78 = arith.addf %76, %77 : vector<4x8x8xf32>
    %c1_i32 = arith.constant 1 : i32
    %79 = tpu.reciprocal %74 {approx = true} : vector<4x8x1xf32> -> vector<4x8x1xf32>
    %80 = vector.broadcast %79 : vector<4x8x1xf32> to vector<4x8x8xf32>
    %81 = arith.mulf %78, %80 : vector<4x8x8xf32>
    %82 = tpu.transpose %81, [1, 0, 2] : vector<4x8x8xf32> -> vector<8x4x8xf32>
    %83 = vector.shape_cast %82 : vector<8x4x8xf32> to vector<8x32xf32>
    %84 = arith.truncf %83 : vector<8x32xf32> to vector<8x32xbf16>
    %c0_26 = arith.constant 0 : index
    %c0_27 = arith.constant 0 : index
    %85 = vector.load %arg11[%c0_26, %c0_27] : memref<32x32xbf16, #tpu.memory_space<vmem>>, vector<32x32xbf16>
    %cst_28 = arith.constant dense<0.000000e+00> : vector<8x32xf32>
    %86 = tpu.matmul %84, %85, %cst_28 {dimension_numbers = #tpu.dot_dimension_numbers<[1], [0], [0], [1], [0, 0, 1, 1], [], []>} : vector<8x32xbf16>, vector<32x32xbf16>, vector<8x32xf32> -> vector<8x32xf32>
    %c0_29 = arith.constant 0 : index
    %c0_30 = arith.constant 0 : index
    %87 = vector.load %arg12[%c0_29, %c0_30] : memref<1x32xf32, #tpu.memory_space<vmem>>, vector<1x32xf32>
    %88 = vector.shape_cast %87 : vector<1x32xf32> to vector<32xf32>
    %89 = vector.shape_cast %88 : vector<32xf32> to vector<1x32xf32>
    %90 = vector.broadcast %89 : vector<1x32xf32> to vector<8x32xf32>
    %91 = arith.addf %86, %90 : vector<8x32xf32>
    %92 = arith.addf %91, %7 : vector<8x32xf32>
    %c0_31 = arith.constant 0 : index
    %c0_32 = arith.constant 0 : index
    %93 = vector.load %arg13[%c0_31, %c0_32] : memref<1x32xf32, #tpu.memory_space<vmem>>, vector<1x32xf32>
    %94 = vector.shape_cast %93 : vector<1x32xf32> to vector<32xf32>
    %c0_33 = arith.constant 0 : index
    %c0_34 = arith.constant 0 : index
    %95 = vector.load %arg14[%c0_33, %c0_34] : memref<1x32xf32, #tpu.memory_space<vmem>>, vector<1x32xf32>
    %96 = vector.shape_cast %95 : vector<1x32xf32> to vector<32xf32>
    %cst_35 = arith.constant dense<0.000000e+00> : vector<8xf32>
    %97 = vector.multi_reduction <add>, %92, %cst_35 [1] : vector<8x32xf32> to vector<8xf32>
    %98 = vector.shape_cast %97 : vector<8xf32> to vector<8x1xf32>
    %cst_36 = arith.constant 3.200000e+01 : f32
    %99 = vector.broadcast %cst_36 : f32 to vector<8x1xf32>
    %100 = arith.divf %98, %99 : vector<8x1xf32>
    %101 = vector.broadcast %100 : vector<8x1xf32> to vector<8x32xf32>
    %102 = arith.subf %92, %101 : vector<8x32xf32>
    %103 = arith.mulf %102, %102 : vector<8x32xf32>
    %cst_37 = arith.constant dense<0.000000e+00> : vector<8xf32>
    %104 = vector.multi_reduction <add>, %103, %cst_37 [1] : vector<8x32xf32> to vector<8xf32>
    %105 = vector.shape_cast %104 : vector<8xf32> to vector<8x1xf32>
    %cst_38 = arith.constant 3.200000e+01 : f32
    %106 = vector.broadcast %cst_38 : f32 to vector<8x1xf32>
    %107 = arith.divf %105, %106 : vector<8x1xf32>
    %108 = vector.broadcast %100 : vector<8x1xf32> to vector<8x32xf32>
    %109 = arith.subf %92, %108 : vector<8x32xf32>
    %cst_39 = arith.constant 9.99999974E-6 : f32
    %110 = vector.broadcast %cst_39 : f32 to vector<8x1xf32>
    %111 = arith.addf %107, %110 : vector<8x1xf32>
    %112 = math.rsqrt %111 : vector<8x1xf32>
    %113 = vector.broadcast %112 : vector<8x1xf32> to vector<8x32xf32>
    %114 = arith.mulf %109, %113 : vector<8x32xf32>
    %115 = vector.shape_cast %94 : vector<32xf32> to vector<1x32xf32>
    %116 = vector.broadcast %115 : vector<1x32xf32> to vector<8x32xf32>
    %117 = arith.mulf %114, %116 : vector<8x32xf32>
    %118 = vector.shape_cast %96 : vector<32xf32> to vector<1x32xf32>
    %119 = vector.broadcast %118 : vector<1x32xf32> to vector<8x32xf32>
    %120 = arith.addf %117, %119 : vector<8x32xf32>
    %121 = arith.truncf %120 : vector<8x32xf32> to vector<8x32xbf16>
    %c0_40 = arith.constant 0 : index
    %c0_41 = arith.constant 0 : index
    %122 = vector.load %arg15[%c0_40, %c0_41] : memref<32x32xbf16, #tpu.memory_space<vmem>>, vector<32x32xbf16>
    %cst_42 = arith.constant dense<0.000000e+00> : vector<8x32xf32>
    %123 = tpu.matmul %121, %122, %cst_42 {dimension_numbers = #tpu.dot_dimension_numbers<[1], [0], [0], [1], [0, 0, 1, 1], [], []>} : vector<8x32xbf16>, vector<32x32xbf16>, vector<8x32xf32> -> vector<8x32xf32>
    %124 = arith.addf %92, %123 : vector<8x32xf32>
    %c0_43 = arith.constant 0 : index
    %c0_44 = arith.constant 0 : index
    %125 = vector.load %arg16[%c0_43, %c0_44] : memref<1x32xf32, #tpu.memory_space<vmem>>, vector<1x32xf32>
    %126 = vector.shape_cast %125 : vector<1x32xf32> to vector<32xf32>
    %127 = vector.shape_cast %126 : vector<32xf32> to vector<1x32xf32>
    %128 = vector.broadcast %127 : vector<1x32xf32> to vector<8x32xf32>
    %129 = arith.addf %124, %128 : vector<8x32xf32>
    %c0_45 = arith.constant 0 : index
    %130 = arith.index_cast %4 : i32 to index
    %c0_46 = arith.constant 0 : index
    %131 = vector.load %arg17[%c0_45, %130, %c0_46] : memref<1x8x32xf32, #tpu.memory_space<vmem>>, vector<1x8x32xf32>
    %132 = vector.shape_cast %131 : vector<1x8x32xf32> to vector<8x32xf32>
    %133 = vector.shape_cast %129 : vector<8x32xf32> to vector<1x8x32xf32>
    tpu.vector_store %arg17[%c0_45, %130, %c0_46], %133 {strides = array<i32>} : memref<1x8x32xf32, #tpu.memory_space<vmem>>, vector<1x8x32xf32>,
    return
  }
  func.func @transform_0(%arg0: i32, %arg1: i32) -> (i32, i32, i32) {
    %c0_i32 = arith.constant 0 : i32
    %c0_i32_0 = arith.constant 0 : i32
    %c0_i32_1 = arith.constant 0 : i32
    return %arg0, %c0_i32, %c0_i32_0 : i32, i32, i32
  }
  func.func @transform_1(%arg0: i32, %arg1: i32) -> (i32, i32) {
    %c0_i32 = arith.constant 0 : i32
    %c0_i32_0 = arith.constant 0 : i32
    %c0_i32_1 = arith.constant 0 : i32
    return %c0_i32, %c0_i32_0 : i32, i32
  }
  func.func @transform_2(%arg0: i32, %arg1: i32) -> (i32, i32) {
    %c0_i32 = arith.constant 0 : i32
    %c0_i32_0 = arith.constant 0 : i32
    %c0_i32_1 = arith.constant 0 : i32
    return %c0_i32, %c0_i32_0 : i32, i32
  }
  func.func @transform_3(%arg0: i32, %arg1: i32) -> (i32, i32) {
    %c0_i32 = arith.constant 0 : i32
    %c0_i32_0 = arith.constant 0 : i32
    %c0_i32_1 = arith.constant 0 : i32
    return %c0_i32, %c0_i32_0 : i32, i32
  }
  func.func @transform_4(%arg0: i32, %arg1: i32) -> (i32, i32) {
    %c0_i32 = arith.constant 0 : i32
    %c0_i32_0 = arith.constant 0 : i32
    %c0_i32_1 = arith.constant 0 : i32
    return %c0_i32, %c0_i32_0 : i32, i32
  }
  func.func @transform_5(%arg0: i32, %arg1: i32) -> (i32, i32) {
    %c0_i32 = arith.constant 0 : i32
    %c0_i32_0 = arith.constant 0 : i32
    %c0_i32_1 = arith.constant 0 : i32
    return %c0_i32, %c0_i32_0 : i32, i32
  }
  func.func @transform_6(%arg0: i32, %arg1: i32) -> (i32, i32) {
    %c0_i32 = arith.constant 0 : i32
    %c0_i32_0 = arith.constant 0 : i32
    %c0_i32_1 = arith.constant 0 : i32
    return %c0_i32, %c0_i32_0 : i32, i32
  }
  func.func @transform_7(%arg0: i32, %arg1: i32) -> (i32, i32) {
    %c0_i32 = arith.constant 0 : i32
    %c0_i32_0 = arith.constant 0 : i32
    %c0_i32_1 = arith.constant 0 : i32
    return %c0_i32, %c0_i32_0 : i32, i32
  }
  func.func @transform_8(%arg0: i32, %arg1: i32) -> (i32, i32) {
    %c0_i32 = arith.constant 0 : i32
    %c0_i32_0 = arith.constant 0 : i32
    %c0_i32_1 = arith.constant 0 : i32
    return %c0_i32, %c0_i32_0 : i32, i32
  }
  func.func @transform_9(%arg0: i32, %arg1: i32) -> (i32, i32) {
    %c0_i32 = arith.constant 0 : i32
    %c0_i32_0 = arith.constant 0 : i32
    %c0_i32_1 = arith.constant 0 : i32
    return %c0_i32, %c0_i32_0 : i32, i32
  }
  func.func @transform_10(%arg0: i32, %arg1: i32) -> (i32, i32) {
    %c0_i32 = arith.constant 0 : i32
    %c0_i32_0 = arith.constant 0 : i32
    %c0_i32_1 = arith.constant 0 : i32
    return %c0_i32, %c0_i32_0 : i32, i32
  }
  func.func @transform_11(%arg0: i32, %arg1: i32) -> (i32, i32) {
    %c0_i32 = arith.constant 0 : i32
    %c0_i32_0 = arith.constant 0 : i32
    %c0_i32_1 = arith.constant 0 : i32
    return %c0_i32, %c0_i32_0 : i32, i32
  }
  func.func @transform_12(%arg0: i32, %arg1: i32) -> (i32, i32) {
    %c0_i32 = arith.constant 0 : i32
    %c0_i32_0 = arith.constant 0 : i32
    %c0_i32_1 = arith.constant 0 : i32
    return %c0_i32, %c0_i32_0 : i32, i32
  }
  func.func @transform_13(%arg0: i32, %arg1: i32) -> (i32, i32) {
    %c0_i32 = arith.constant 0 : i32
    %c0_i32_0 = arith.constant 0 : i32
    %c0_i32_1 = arith.constant 0 : i32
    return %c0_i32, %c0_i32_0 : i32, i32
  }
  func.func @transform_14(%arg0: i32, %arg1: i32) -> (i32, i32) {
    %c0_i32 = arith.constant 0 : i32
    %c0_i32_0 = arith.constant 0 : i32
    %c0_i32_1 = arith.constant 0 : i32
    return %c0_i32, %c0_i32_0 : i32, i32
  }
  func.func @transform_15(%arg0: i32, %arg1: i32) -> (i32, i32, i32) {
    %c0_i32 = arith.constant 0 : i32
    %c0_i32_0 = arith.constant 0 : i32
    %c0_i32_1 = arith.constant 0 : i32
    return %arg0, %c0_i32, %c0_i32_0 : i32, i32, i32
  }
}

</mosaic_0001>

<bundles_post_ra>
// kernel: tpu_custom_call.1
= control target key start
LH: loop header
LB: loop body
LE: loop exit
PB: predicated region body
PF: predicated region fallthrough
CT: control target
= control target key end

     0   :  { %s4219_s0 = inlined_call_operand.hbm [shape: f32[2,8,32], index: 0, kind: input, shape index: {}]   ;;  %s4220_s1 = inlined_call_operand.hbm [shape: f32[1,32], index: 1, kind: input, shape index: {}]   ;;  %s4221_s2 = inlined_call_operand.hbm [shape: f32[1,32], index: 2, kind: input, shape index: {}]   ;;  %s4222_s3 = inlined_call_operand.hbm [shape: bf16[32,32], index: 3, kind: input, shape index: {}]   ;;  %s4223_s4 = inlined_call_operand.hbm [shape: f32[1,32], index: 4, kind: input, shape index: {}]   ;;  %s4224_s5 = inlined_call_operand.hbm [shape: bf16[32,32], index: 5, kind: input, shape index: {}]   ;;  %s4225_s6 = inlined_call_operand.hbm [shape: f32[1,32], index: 6, kind: input, shape index: {}]   ;;  %s4226_s7 = inlined_call_operand.hbm [shape: bf16[32,32], index: 7, kind: input, shape index: {}]   ;;  %s4227_s8 = inlined_call_operand.hbm [shape: f32[1,32], index: 8, kind: input, shape index: {}]   ;;  %s4228_s9 = inlined_call_operand.hbm [shape: bf16[32,32], index: 9, kind: input, shape index: {}]   ;;  %s4229_s10 = inlined_call_operand.hbm [shape: f32[1,32], index: 10, kind: input, shape index: {}]   ;;  %s4230_s11 = inlined_call_operand.hbm [shape: f32[1,32], index: 11, kind: input, shape index: {}]   ;;  %s4231_s12 = inlined_call_operand.hbm [shape: f32[1,32], index: 12, kind: input, shape index: {}]   ;;  %s4232_s13 = inlined_call_operand.hbm [shape: bf16[32,32], index: 13, kind: input, shape index: {}]   ;;  %s4233_s14 = inlined_call_operand.hbm [shape: f32[1,32], index: 14, kind: input, shape index: {}]   ;;  %s4234_s15 = inlined_call_operand.hbm [shape: f32[2,8,32], index: 15, kind: output, shape index: {}]  }
   0x1   :  { %4247 = sst [smem:[#allocation45_spill]] %s4219_s0 }
   0x2   :  { %4248 = sst [smem:[#allocation46_spill]] %s4220_s1 }
   0x3   :  { %4249 = sst [smem:[#allocation47_spill]] %s4221_s2 }
   0x4   :  { %4250 = sst [smem:[#allocation48_spill]] %s4222_s3 }
   0x5   :  { %4251 = sst [smem:[#allocation49_spill]] %s4234_s15 }
   0x6   :  { %20 = vsyncpa [#allocation6], 0 }
   0x7   :  { %22 = vsyncpa [#allocation6 + $0x1], 0 }
   0x8   :  { %23 = vsyncpa [#allocation9], 0 }
   0x9   :  { %24 = vsyncpa [#allocation12], 0 }
   0xa   :  { %25 = vsyncpa [#allocation15], 0 }
   0xb   :  { %26 = vsyncpa [#allocation18], 0 }
   0xc   :  { %27 = vsyncpa [#allocation21], 0 }
   0xd   :  { %28 = vsyncpa [#allocation24], 0 }
   0xe   :  { %29 = vsyncpa [#allocation27], 0 }
   0xf   :  { %30 = vsyncpa [#allocation7], 0 }
  0x10   :  { %32 = vsyncpa [#allocation7 + $0x1], 0  ;;  %s3529_s18 = smov 0   ;;  %s3531_s19 = smov 0  }
  0x11   :  { %s3533_s20 = smov 0   ;;  %s3535_s21 = smov 0  }
  0x12   :  { %s3537_s22 = smov 0   ;;  %s3539_s23 = smov 0  }
  0x13 LB: > { %4252 = sst [smem:[#allocation39_spill]] %s3398_s18  ;;  %s4235_s24 = sadd.s32 4294967295, %s3418_s23   ;;  %s3418_s23 = sphi %s3539_s23, %s38_s23   ;;  %s3414_s22 = sphi %s3537_s22, %s4292_s22   ;;  %s3410_s21 = sphi %s3535_s21, %s4291_s21   ;;  %s3406_s20 = sphi %s3533_s20, %s4290_s20   ;;  %s3402_s19 = sphi %s3531_s19, %s4289_s19   ;;  %s3398_s18 = sphi %s3529_s18, %s4288_s18  }
  0x14   : > { %4253 = sst [smem:[#allocation40_spill]] %s3402_s19  ;;  %p2430_p0 = scmp.ge.s32.totalorder %s3418_s23, 1 }
  0x15   : > { %4254 = sst [smem:[#allocation41_spill]] %s3406_s20  ;;  %p3563_p1 = scmp.eq.s32.totalorder %s4235_s24, 0 }
  0x16   : > { %4255 = sst [smem:[#allocation42_spill]] %s3410_s21  ;;  %p401_p2 = scmp.lt.s32.totalorder %s3418_s23, 3 }
  0x17   : > { %s4256_s25 = scalar_select %p3563_p1, 1, 0 }
  0x18   : > { %p3568_p3 = pnand %p2430_p0, %p401_p2  ;;  %s3420_s27 = smov [#allocation8]  }
  0x19   : > { %4257 = sst [smem:[#allocation43_spill]] %s4256_s25  ;;  %s414_s28 = sshll.u32 %s3420_s27, 4  ;;  %s415_s28 = int_to_ptr.vmem [resolvable:$true] %s414_s28 }
  0x1a   : > { %s4258_s26 = scalar_select %p3568_p3, 1, 0 }
  0x1b   : > { %p2690_p5 = pneg %p3568_p3  ;;  %s3421_s29 = smov [#allocation11]  }
  0x1c   : > { %4259 = sst [smem:[#allocation44_spill]] %s4258_s26  ;;  %s435_s30 = sshll.u32 %s3421_s29, 4  ;;  %s3581_s30 = int_to_ptr.vmem [resolvable:$true] %s435_s30 }
  0x1d   : > { %p3577_p6 = pnand %p2690_p5, %p3563_p1  ;;  %s3422_s17 = smov [#allocation14]  }
  0x1e   : > { %s3583_s24 = sshll.u32 %s3422_s17, 4  ;;  %s4261_s1 = sld [smem:[#allocation46_spill]]  ;;  %s460_s24 = int_to_ptr.vmem [resolvable:$true] %s3583_s24 }
  0x1f   : > { %p3593_p8 = pneg %p3577_p6 }
  0x24   : > { %s2886_s27 = scalar_lea.hbm %s4261_s1, 16 }
  0x25   : > { %p2887_p7 = scmp.ne.s32.totalorder %s4261_s1, %s2886_s27  ;;  %p2893_p11 = scmp.lt.u32.totalorder %s2886_s27, %s4261_s1 }
  0x27   : > { %p2889_p9 = pnand %p3593_p8, %p2887_p7 }
  0x29   : > { %p2890_p10 = pneg %p2889_p9 }
  0x2b   : > { %p2895_p12 = pnand %p2893_p11, %p2890_p10 }
  0x2d   : > { %2898 = shalt.err (!%p2895_p12)
}
  0x2e   : > { %s2899_s15 = scalar_lea.vmem %s415_s28, 16  ;;  %s2906_s0 = scalar_lea.vmem %s415_s28, 32 }
  0x2f   : > { %p2900_p13 = scmp.ne.s32.totalorder %s415_s28, %s2899_s15  ;;  %p2907_p5 = scmp.lt.s32.totalorder %s415_s28, %s415_s28 }
  0x30   : > { %p2908_p4 = scmp.lt.s32.totalorder %s2906_s0, %s2899_s15 }
  0x31   : > { %p2902_p0 = pnand %p2900_p13, %p3593_p8 }
  0x32   : > { %p2909_p3 = por %p2908_p4, %p2907_p5 }
  0x33   : > { %p2903_p2 = pneg %p2902_p0 }
  0x35   : > { %p2910_p1 = pnand %p2909_p3, %p2903_p2 }
  0x37   : > { %2913 = shalt.err (!%p2910_p1)
}
  0x38   : > { %2693 = dma.hbm_to_vmem [thread:$0]  (!%p3577_p6), %s4261_s1, 16, %s415_s28, [#allocation9]  }
  0x39   : > { %s4263_s3 = sld [smem:[#allocation48_spill]] }
  0x3f   : > { %s2914_s17 = scalar_lea.hbm %s4263_s3, 256 }
  0x40   : > { %p2915_p7 = scmp.ne.s32.totalorder %s4263_s3, %s2914_s17  ;;  %p2921_p1 = scmp.lt.u32.totalorder %s2914_s17, %s4263_s3 }
  0x42   : > { %p2917_p9 = pnand %p2915_p7, %p3593_p8 }
  0x44   : > { %p2918_p4 = pneg %p2917_p9 }
  0x46   : > { %p2923_p3 = pnand %p2921_p1, %p2918_p4 }
  0x48   : > { %2926 = shalt.err (!%p2923_p3)
}
  0x49   : > { %s2927_s28 = scalar_lea.vmem %s3581_s30, 256  ;;  %p2935_p13 = scmp.lt.s32.totalorder %s3581_s30, %s3581_s30 }
  0x4a   : > { %p2928_p10 = scmp.ne.s32.totalorder %s3581_s30, %s2927_s28  ;;  %p2936_p0 = scmp.lt.s32.totalorder %s2927_s28, %s2927_s28 }
  0x4c   : > { %p2930_p11 = pnand %p2928_p10, %p3593_p8  ;;  %p2937_p2 = por %p2936_p0, %p2935_p13 }
  0x4e   : > { %p2931_p12 = pneg %p2930_p11 }
  0x50   : > { %p2938_p5 = pnand %p2937_p2, %p2931_p12 }
  0x52   : > { %2941 = shalt.err (!%p2938_p5)
}
  0x53   : > { %s3423_s18 = smov 64   ;;  %s3424_s19 = smov 4  }
  0x54   : > { %2699 = dma.hbm_to_vmem [thread:$0]  (!%p3577_p6), %s4263_s3, 256, %s3581_s30, [#allocation12], %s3423_s18, %s3423_s18, %s3424_s19  }
  0x55   : > { %s2942_s17 = scalar_lea.hbm %s4224_s5, 256 }
  0x56   : > { %p2943_p7 = scmp.ne.s32.totalorder %s4224_s5, %s2942_s17  ;;  %p2949_p1 = scmp.lt.u32.totalorder %s2942_s17, %s4224_s5 }
  0x58   : > { %p2945_p9 = pnand %p2943_p7, %p3593_p8 }
  0x5a   : > { %p2946_p4 = pneg %p2945_p9 }
  0x5c   : > { %p2951_p3 = pnand %p2949_p1, %p2946_p4 }
  0x5e   : > { %2954 = shalt.err (!%p2951_p3)
}
  0x5f   : > { %s2955_s21 = scalar_lea.vmem %s460_s24, 256  ;;  %p2963_p13 = scmp.lt.s32.totalorder %s460_s24, %s460_s24 }
  0x60   : > { %p2956_p10 = scmp.ne.s32.totalorder %s460_s24, %s2955_s21  ;;  %p2964_p0 = scmp.lt.s32.totalorder %s2955_s21, %s2955_s21 }
  0x62   : > { %p2958_p11 = pnand %p2956_p10, %p3593_p8  ;;  %p2965_p2 = por %p2964_p0, %p2963_p13 }
  0x64   : > { %p2959_p12 = pneg %p2958_p11 }
  0x66   : > { %p2966_p5 = pnand %p2965_p2, %p2959_p12 }
  0x68   : > { %2969 = shalt.err (!%p2966_p5)
}
  0x69   : > { %2705 = dma.hbm_to_vmem [thread:$0]  (!%p3577_p6), %s4224_s5, 256, %s460_s24, [#allocation15], %s3423_s18, %s3423_s18, %s3424_s19  }
  0x6a   : > { %s3425_s26 = smov [#allocation17]   ;;  %s3426_s27 = smov [#allocation20]  }
  0x6b   : > { %s483_s25 = sshll.u32 %s3425_s26, 4  ;;  %s507_s17 = sshll.u32 %s3426_s27, 4  ;;  %s484_s25 = int_to_ptr.vmem [resolvable:$true] %s483_s25  ;;  %s508_s17 = int_to_ptr.vmem [resolvable:$true] %s507_s17 }
  0x6c   : > { %s2970_s28 = scalar_lea.hbm %s4226_s7, 256 }
  0x6d   : > { %p2971_p7 = scmp.ne.s32.totalorder %s4226_s7, %s2970_s28  ;;  %p2977_p1 = scmp.lt.u32.totalorder %s2970_s28, %s4226_s7 }
  0x6f   : > { %p2973_p9 = pnand %p2971_p7, %p3593_p8 }
  0x71   : > { %p2974_p4 = pneg %p2973_p9 }
  0x73   : > { %p2979_p3 = pnand %p2977_p1, %p2974_p4 }
  0x75   : > { %2982 = shalt.err (!%p2979_p3)
}
  0x76   : > { %s2983_s24 = scalar_lea.vmem %s484_s25, 256  ;;  %p2991_p13 = scmp.lt.s32.totalorder %s484_s25, %s484_s25 }
  0x77   : > { %p2984_p10 = scmp.ne.s32.totalorder %s484_s25, %s2983_s24  ;;  %p2992_p0 = scmp.lt.s32.totalorder %s2983_s24, %s2983_s24 }
  0x79   : > { %p2986_p11 = pnand %p2984_p10, %p3593_p8  ;;  %p2993_p2 = por %p2992_p0, %p2991_p13 }
  0x7b   : > { %p2987_p12 = pneg %p2986_p11 }
  0x7d   : > { %p2994_p5 = pnand %p2993_p2, %p2987_p12 }
  0x7f   : > { %2997 = shalt.err (!%p2994_p5)
}
  0x80   : > { %2711 = dma.hbm_to_vmem [thread:$0]  (!%p3577_p6), %s4226_s7, 256, %s484_s25, [#allocation18], %s3423_s18, %s3423_s18, %s3424_s19  }
  0x81   : > { %s2998_s27 = scalar_lea.hbm %s4228_s9, 256 }
  0x82   : > { %p2999_p7 = scmp.ne.s32.totalorder %s4228_s9, %s2998_s27  ;;  %p3005_p1 = scmp.lt.u32.totalorder %s2998_s27, %s4228_s9 }
  0x84   : > { %p3001_p9 = pnand %p2999_p7, %p3593_p8 }
  0x86   : > { %p3002_p4 = pneg %p3001_p9 }
  0x88   : > { %p3007_p3 = pnand %p3005_p1, %p3002_p4 }
  0x8a   : > { %3010 = shalt.err (!%p3007_p3)
}
  0x8b   : > { %s3011_s1 = scalar_lea.vmem %s508_s17, 256  ;;  %p3019_p13 = scmp.lt.s32.totalorder %s508_s17, %s508_s17 }
  0x8c   : > { %p3012_p10 = scmp.ne.s32.totalorder %s508_s17, %s3011_s1  ;;  %p3020_p0 = scmp.lt.s32.totalorder %s3011_s1, %s3011_s1 }
  0x8e   : > { %p3014_p11 = pnand %p3012_p10, %p3593_p8  ;;  %p3021_p2 = por %p3020_p0, %p3019_p13 }
  0x90   : > { %p3015_p12 = pneg %p3014_p11 }
  0x92   : > { %p3022_p5 = pnand %p3021_p2, %p3015_p12 }
  0x94   : > { %3025 = shalt.err (!%p3022_p5)
}
  0x95   : > { %2717 = dma.hbm_to_vmem [thread:$0]  (!%p3577_p6), %s4228_s9, 256, %s508_s17, [#allocation21], %s3423_s18, %s3423_s18, %s3424_s19  }
  0x96   : > { %s3427_s3 = smov [#allocation23]   ;;  %s3428_s30 = smov [#allocation26]  }
  0x97   : > { %s532_s20 = sshll.u32 %s3427_s3, 4  ;;  %s553_s26 = sshll.u32 %s3428_s30, 4  ;;  %s533_s20 = int_to_ptr.vmem [resolvable:$true] %s532_s20  ;;  %s554_s26 = int_to_ptr.vmem [resolvable:$true] %s553_s26 }
  0x98   : > { %s3026_s0 = scalar_lea.hbm %s4230_s11, 16 }
  0x99   : > { %p3027_p7 = scmp.ne.s32.totalorder %s4230_s11, %s3026_s0  ;;  %p3033_p1 = scmp.lt.u32.totalorder %s3026_s0, %s4230_s11 }
  0x9b   : > { %p3029_p9 = pnand %p3027_p7, %p3593_p8 }
  0x9d   : > { %p3030_p4 = pneg %p3029_p9 }
  0x9f   : > { %p3035_p3 = pnand %p3033_p1, %p3030_p4 }
  0xa1   : > { %3038 = shalt.err (!%p3035_p3)
}
  0xa2   : > { %s3039_s17 = scalar_lea.vmem %s533_s20, 16  ;;  %s3046_s24 = scalar_lea.vmem %s533_s20, 32 }
  0xa3   : > { %p3040_p10 = scmp.ne.s32.totalorder %s533_s20, %s3039_s17  ;;  %p3047_p13 = scmp.lt.s32.totalorder %s533_s20, %s533_s20 }
  0xa4   : > { %p3048_p0 = scmp.lt.s32.totalorder %s3046_s24, %s3039_s17 }
  0xa5   : > { %p3042_p11 = pnand %p3040_p10, %p3593_p8 }
  0xa6   : > { %p3049_p2 = por %p3048_p0, %p3047_p13 }
  0xa7   : > { %p3043_p12 = pneg %p3042_p11 }
  0xa9   : > { %p3050_p5 = pnand %p3049_p2, %p3043_p12 }
  0xab   : > { %3053 = shalt.err (!%p3050_p5)
}
  0xac   : > { %2723 = dma.hbm_to_vmem [thread:$0]  (!%p3577_p6), %s4230_s11, 16, %s533_s20, [#allocation24]  }
  0xad   : > { %s3054_s0 = scalar_lea.hbm %s4232_s13, 256 }
  0xae   : > { %p3055_p7 = scmp.ne.s32.totalorder %s4232_s13, %s3054_s0  ;;  %p3061_p1 = scmp.lt.u32.totalorder %s3054_s0, %s4232_s13 }
  0xb0   : > { %p3057_p9 = pnand %p3055_p7, %p3593_p8 }
  0xb2   : > { %p3058_p4 = pneg %p3057_p9 }
  0xb4   : > { %p3063_p3 = pnand %p3061_p1, %p3058_p4 }
  0xb6   : > { %3066 = shalt.err (!%p3063_p3)
}
  0xb7   : > { %s3067_s17 = scalar_lea.vmem %s554_s26, 256  ;;  %p3075_p13 = scmp.lt.s32.totalorder %s554_s26, %s554_s26 }
  0xb8   : > { %p3068_p10 = scmp.ne.s32.totalorder %s554_s26, %s3067_s17  ;;  %p3076_p0 = scmp.lt.s32.totalorder %s3067_s17, %s3067_s17 }
  0xba   : > { %p3070_p11 = pnand %p3068_p10, %p3593_p8  ;;  %p3077_p2 = por %p3076_p0, %p3075_p13 }
  0xbc   : > { %p3071_p12 = pneg %p3070_p11 }
  0xbe   : > { %p3078_p5 = pnand %p3077_p2, %p3071_p12 }
  0xc0   : > { %3081 = shalt.err (!%p3078_p5)
}
  0xc1   : > { %2729 = dma.hbm_to_vmem [thread:$0]  (!%p3577_p6), %s4232_s13, 256, %s554_s26, [#allocation27], %s3423_s18, %s3423_s18, %s3424_s19  }
  0xc2   : > { %s3429_s3 = smov [#allocation10]   ;;  %s3430_s27 = smov [#allocation13]  }
  0xc3   : > { %s425_s30 = sshll.u32 %s3429_s3, 4  ;;  %s449_s15 = sshll.u32 %s3430_s27, 4  ;;  %s426_s30 = int_to_ptr.vmem [resolvable:$true] %s425_s30  ;;  %s450_s15 = int_to_ptr.vmem [resolvable:$true] %s449_s15 }
  0xc4   : > { %s4264_s2 = sld [smem:[#allocation47_spill]] }
  0xca   : > { %s3082_s21 = scalar_lea.hbm %s4264_s2, 16 }
  0xcb   : > { %p3083_p7 = scmp.ne.s32.totalorder %s4264_s2, %s3082_s21  ;;  %p3089_p1 = scmp.lt.u32.totalorder %s3082_s21, %s4264_s2 }
  0xcd   : > { %p3085_p9 = pnand %p3083_p7, %p3593_p8 }
  0xcf   : > { %p3086_p4 = pneg %p3085_p9 }
  0xd1   : > { %p3091_p3 = pnand %p3089_p1, %p3086_p4 }
  0xd3   : > { %3094 = shalt.err (!%p3091_p3)
}
  0xd4   : > { %s3095_s18 = scalar_lea.vmem %s426_s30, 16  ;;  %s3102_s19 = scalar_lea.vmem %s426_s30, 32 }
  0xd5   : > { %p3096_p10 = scmp.ne.s32.totalorder %s426_s30, %s3095_s18  ;;  %p3103_p13 = scmp.lt.s32.totalorder %s426_s30, %s426_s30 }
  0xd6   : > { %p3104_p0 = scmp.lt.s32.totalorder %s3102_s19, %s3095_s18 }
  0xd7   : > { %p3098_p11 = pnand %p3096_p10, %p3593_p8 }
  0xd8   : > { %p3105_p2 = por %p3104_p0, %p3103_p13 }
  0xd9   : > { %p3099_p12 = pneg %p3098_p11 }
  0xdb   : > { %p3106_p5 = pnand %p3105_p2, %p3099_p12 }
  0xdd   : > { %3109 = shalt.err (!%p3106_p5)
}
  0xde   : > { %2696 = dma.hbm_to_vmem [thread:$0]  (!%p3577_p6), %s4264_s2, 16, %s426_s30, [#allocation9]  }
  0xdf   : > { %s3110_s0 = scalar_lea.hbm %s4223_s4, 16 }
  0xe0   : > { %p3111_p7 = scmp.ne.s32.totalorder %s4223_s4, %s3110_s0  ;;  %p3117_p1 = scmp.lt.u32.totalorder %s3110_s0, %s4223_s4 }
  0xe2   : > { %p3113_p9 = pnand %p3111_p7, %p3593_p8 }
  0xe4   : > { %p3114_p4 = pneg %p3113_p9 }
  0xe6   : > { %p3119_p3 = pnand %p3117_p1, %p3114_p4 }
  0xe8   : > { %3122 = shalt.err (!%p3119_p3)
}
  0xe9   : > { %s3123_s17 = scalar_lea.vmem %s450_s15, 16  ;;  %s3130_s30 = scalar_lea.vmem %s450_s15, 32 }
  0xea   : > { %p3124_p10 = scmp.ne.s32.totalorder %s450_s15, %s3123_s17  ;;  %p3131_p13 = scmp.lt.s32.totalorder %s450_s15, %s450_s15 }
  0xeb   : > { %p3132_p0 = scmp.lt.s32.totalorder %s3130_s30, %s3123_s17 }
  0xec   : > { %p3126_p11 = pnand %p3124_p10, %p3593_p8 }
  0xed   : > { %p3133_p2 = por %p3132_p0, %p3131_p13 }
  0xee   : > { %p3127_p12 = pneg %p3126_p11 }
  0xf0   : > { %p3134_p5 = pnand %p3133_p2, %p3127_p12 }
  0xf2   : > { %3137 = shalt.err (!%p3134_p5)
}
  0xf3   : > { %2702 = dma.hbm_to_vmem [thread:$0]  (!%p3577_p6), %s4223_s4, 16, %s450_s15, [#allocation12]  }
  0xf4   : > { %s3431_s19 = smov [#allocation16]   ;;  %s3432_s24 = smov [#allocation19]  }
  0xf5   : > { %s473_s26 = sshll.u32 %s3431_s19, 4  ;;  %s497_s3 = sshll.u32 %s3432_s24, 4  ;;  %s474_s26 = int_to_ptr.vmem [resolvable:$true] %s473_s26  ;;  %s498_s3 = int_to_ptr.vmem [resolvable:$true] %s497_s3 }
  0xf6   : > { %s3138_s28 = scalar_lea.hbm %s4225_s6, 16 }
  0xf7   : > { %p3139_p7 = scmp.ne.s32.totalorder %s4225_s6, %s3138_s28  ;;  %p3145_p1 = scmp.lt.u32.totalorder %s3138_s28, %s4225_s6 }
  0xf9   : > { %p3141_p9 = pnand %p3139_p7, %p3593_p8 }
  0xfb   : > { %p3142_p4 = pneg %p3141_p9 }
  0xfd   : > { %p3147_p3 = pnand %p3145_p1, %p3142_p4 }
  0xff   : > { %3150 = shalt.err (!%p3147_p3)
}
 0x100   : > { %s3151_s15 = scalar_lea.vmem %s474_s26, 16  ;;  %s3158_s30 = scalar_lea.vmem %s474_s26, 32 }
 0x101   : > { %p3152_p10 = scmp.ne.s32.totalorder %s474_s26, %s3151_s15  ;;  %p3159_p13 = scmp.lt.s32.totalorder %s474_s26, %s474_s26 }
 0x102   : > { %p3160_p0 = scmp.lt.s32.totalorder %s3158_s30, %s3151_s15 }
 0x103   : > { %p3154_p11 = pnand %p3152_p10, %p3593_p8 }
 0x104   : > { %p3161_p2 = por %p3160_p0, %p3159_p13 }
 0x105   : > { %p3155_p12 = pneg %p3154_p11 }
 0x107   : > { %p3162_p5 = pnand %p3161_p2, %p3155_p12 }
 0x109   : > { %3165 = shalt.err (!%p3162_p5)
}
 0x10a   : > { %2708 = dma.hbm_to_vmem [thread:$0]  (!%p3577_p6), %s4225_s6, 16, %s474_s26, [#allocation15]  }
 0x10b   : > { %s3166_s27 = scalar_lea.hbm %s4227_s8, 16 }
 0x10c   : > { %p3167_p7 = scmp.ne.s32.totalorder %s4227_s8, %s3166_s27  ;;  %p3173_p1 = scmp.lt.u32.totalorder %s3166_s27, %s4227_s8 }
 0x10e   : > { %p3169_p9 = pnand %p3167_p7, %p3593_p8 }
 0x110   : > { %p3170_p4 = pneg %p3169_p9 }
 0x112   : > { %p3175_p3 = pnand %p3173_p1, %p3170_p4 }
 0x114   : > { %3178 = shalt.err (!%p3175_p3)
}
 0x115   : > { %s3179_s25 = scalar_lea.vmem %s498_s3, 16  ;;  %s3186_s26 = scalar_lea.vmem %s498_s3, 32 }
 0x116   : > { %p3180_p10 = scmp.ne.s32.totalorder %s498_s3, %s3179_s25  ;;  %p3187_p13 = scmp.lt.s32.totalorder %s498_s3, %s498_s3 }
 0x117   : > { %p3188_p0 = scmp.lt.s32.totalorder %s3186_s26, %s3179_s25 }
 0x118   : > { %p3182_p11 = pnand %p3180_p10, %p3593_p8 }
 0x119   : > { %p3189_p2 = por %p3188_p0, %p3187_p13 }
 0x11a   : > { %p3183_p12 = pneg %p3182_p11 }
 0x11c   : > { %p3190_p5 = pnand %p3189_p2, %p3183_p12 }
 0x11e   : > { %3193 = shalt.err (!%p3190_p5)
}
 0x11f   : > { %2714 = dma.hbm_to_vmem [thread:$0]  (!%p3577_p6), %s4227_s8, 16, %s498_s3, [#allocation18]  }
 0x120   : > { %s3433_s30 = smov [#allocation22]   ;;  %s3434_s18 = smov [#allocation25]  }
 0x121   : > { %s521_s20 = sshll.u32 %s3433_s30, 4  ;;  %s543_s19 = sshll.u32 %s3434_s18, 4  ;;  %s522_s20 = int_to_ptr.vmem [resolvable:$true] %s521_s20  ;;  %s544_s19 = int_to_ptr.vmem [resolvable:$true] %s543_s19 }
 0x122   : > { %s3194_s0 = scalar_lea.hbm %s4229_s10, 16 }
 0x123   : > { %p3195_p7 = scmp.ne.s32.totalorder %s4229_s10, %s3194_s0  ;;  %p3201_p1 = scmp.lt.u32.totalorder %s3194_s0, %s4229_s10 }
 0x125   : > { %p3197_p9 = pnand %p3195_p7, %p3593_p8 }
 0x127   : > { %p3198_p4 = pneg %p3197_p9 }
 0x129   : > { %p3203_p3 = pnand %p3201_p1, %p3198_p4 }
 0x12b   : > { %3206 = shalt.err (!%p3203_p3)
}
 0x12c   : > { %s3207_s3 = scalar_lea.vmem %s522_s20, 16  ;;  %s3214_s26 = scalar_lea.vmem %s522_s20, 32 }
 0x12d   : > { %p3208_p10 = scmp.ne.s32.totalorder %s522_s20, %s3207_s3  ;;  %p3215_p13 = scmp.lt.s32.totalorder %s522_s20, %s522_s20 }
 0x12e   : > { %p3216_p0 = scmp.lt.s32.totalorder %s3214_s26, %s3207_s3 }
 0x12f   : > { %p3210_p11 = pnand %p3208_p10, %p3593_p8 }
 0x130   : > { %p3217_p2 = por %p3216_p0, %p3215_p13 }
 0x131   : > { %p3211_p12 = pneg %p3210_p11 }
 0x133   : > { %p3218_p5 = pnand %p3217_p2, %p3211_p12 }
 0x135   : > { %3221 = shalt.err (!%p3218_p5)
}
 0x136   : > { %2720 = dma.hbm_to_vmem [thread:$0]  (!%p3577_p6), %s4229_s10, 16, %s522_s20, [#allocation21]  }
 0x137   : > { %s3222_s24 = scalar_lea.hbm %s4231_s12, 16 }
 0x138   : > { %p3223_p7 = scmp.ne.s32.totalorder %s4231_s12, %s3222_s24  ;;  %p3229_p1 = scmp.lt.u32.totalorder %s3222_s24, %s4231_s12 }
 0x13a   : > { %p3225_p9 = pnand %p3223_p7, %p3593_p8 }
 0x13c   : > { %p3226_p4 = pneg %p3225_p9 }
 0x13e   : > { %p3231_p3 = pnand %p3229_p1, %p3226_p4 }
 0x140   : > { %3234 = shalt.err (!%p3231_p3)
}
 0x141   : > { %s3235_s1 = scalar_lea.vmem %s544_s19, 16  ;;  %s3242_s20 = scalar_lea.vmem %s544_s19, 32 }
 0x142   : > { %p3236_p10 = scmp.ne.s32.totalorder %s544_s19, %s3235_s1  ;;  %p3243_p13 = scmp.lt.s32.totalorder %s544_s19, %s544_s19 }
 0x143   : > { %p3244_p0 = scmp.lt.s32.totalorder %s3242_s20, %s3235_s1 }
 0x144   : > { %p3238_p11 = pnand %p3236_p10, %p3593_p8 }
 0x145   : > { %p3245_p2 = por %p3244_p0, %p3243_p13 }
 0x146   : > { %p3239_p12 = pneg %p3238_p11 }
 0x148   : > { %p3246_p5 = pnand %p3245_p2, %p3239_p12 }
 0x14a   : > { %3249 = shalt.err (!%p3246_p5)
}
 0x14b   : > { %2726 = dma.hbm_to_vmem [thread:$0]  (!%p3577_p6), %s4231_s12, 16, %s544_s19, [#allocation24]  }
 0x14c   : > { %s3435_s26 = smov [#allocation28]   ;;  %s3250_s18 = scalar_lea.hbm %s4233_s14, 16 }
 0x14d   : > { %s567_s17 = sshll.u32 %s3435_s26, 4  ;;  %p3251_p7 = scmp.ne.s32.totalorder %s4233_s14, %s3250_s18  ;;  %s568_s17 = int_to_ptr.vmem [resolvable:$true] %s567_s17 }
 0x14e   : > { %p3257_p1 = scmp.lt.u32.totalorder %s3250_s18, %s4233_s14 }
 0x14f   : > { %p3253_p9 = pnand %p3251_p7, %p3593_p8 }
 0x151   : > { %p3254_p4 = pneg %p3253_p9 }
 0x153   : > { %p3259_p3 = pnand %p3257_p1, %p3254_p4 }
 0x155   : > { %3262 = shalt.err (!%p3259_p3)
}
 0x156   : > { %s3263_s19 = scalar_lea.vmem %s568_s17, 16  ;;  %s3270_s21 = scalar_lea.vmem %s568_s17, 32 }
 0x157   : > { %p3264_p10 = scmp.ne.s32.totalorder %s568_s17, %s3263_s19  ;;  %p3271_p13 = scmp.lt.s32.totalorder %s568_s17, %s568_s17 }
 0x158   : > { %p3272_p0 = scmp.lt.s32.totalorder %s3270_s21, %s3263_s19 }
 0x159   : > { %p3266_p11 = pnand %p3264_p10, %p3593_p8 }
 0x15a   : > { %p3273_p2 = por %p3272_p0, %p3271_p13 }
 0x15b   : > { %p3267_p12 = pneg %p3266_p11 }
 0x15d   : > { %p3274_p5 = pnand %p3273_p2, %p3267_p12 }
 0x15f   : > { %3277 = shalt.err (!%p3274_p5)
}
 0x160   : > { %s4265_s25 = sld [smem:[#allocation41_spill]]  ;;  %s4266_s3 = sld [smem:[#allocation40_spill]] }
 0x161   : > { %s4267_s29 = sld [smem:[#allocation39_spill]]  ;;  %s4268_s26 = sld [smem:[#allocation43_spill]] }
 0x162   : > { %2732 = dma.hbm_to_vmem [thread:$0]  (!%p3577_p6), %s4233_s14, 16, %s568_s17, [#allocation27]  }
 0x163   : > { %s2429_s15 = sadd.s32 4294967294, %s3418_s23   ;;  %s50_s30 = sadd.s32 1, %s3414_s22 }
 0x164   : > { %p52_p8 = scmp.ge.s32.totalorder %s50_s30, 2  ;;  %p65_p9 = scmp.eq.s32.totalorder %s3418_s23, 0 }
 0x165   : > { %s4270_s24 = sadd.s32 4294967295, %s3418_s23   ;;  %p394_p13 = scmp.eq.s32.totalorder %s2429_s15, 1 }
 0x166   : > { %s57_s16 = sadd.s32 1, %s4265_s25  ;;  %p64_p7 = scmp.ne.s32.totalorder %s4265_s25, %s4266_s3 }
 0x167   : > { %s4294_s30 = smov (%p52_p8, %s50_s30), 0  ;;  %p70_p1 = scmp.ne.s32.totalorder %s4266_s3, %s4267_s29 }
 0x168   : > { %p3872_p4 = por %p65_p9, %p64_p7  ;;  %s54_s17 = ssub.s32 %s3414_s22, %s4294_s30 }
 0x169   : > { %p388_p6 = scmp.eq.s32.totalorder %s4270_s24, 1  ;;  %p55_p3 = scmp.eq.s32.totalorder %s54_s17, 0 }
 0x16a   : > { %p4271_p10 = scmp.ne.s32.totalorder %s4268_s26, 0  ;;  %p3895_p0 = por %p394_p13, %p70_p1 }
 0x16b   : > { %p3888_p12 = por %p388_p6, %p64_p7  ;;  %p2755_p2 = scmp.lt.s32.totalorder %s3418_s23, 2 }
 0x16c   : > { %p3884_p11 = por %p4271_p10, %p70_p1  ;;  %s578_s21 = sand.u32 1, %s4265_s25  }
 0x16d   : > { %s4273_s0 = scalar_select %p3888_p12, 1, 0 }
 0x16e   : > { %s3893_s28 = scalar_select %p55_p3, %s4265_s25, %s57_s16  }
 0x16f   : > { %s4274_s19 = scalar_select %p3895_p0, 1, 0 }
 0x170   : > { %s2447_s1 = sshll.u32 %s3414_s22, 7  ;;  %s2446_s20 = sshll.u32 %s578_s21, 3 }
 0x171   : > { %s4275_s26 = sld [smem:[#allocation45_spill]]  ;;  %s582_s15 = scalar_lea.vmem [#allocation5], %s2446_s20 }
 0x172   : > { %s589_s16 = sshll.u32 %s582_s15, 4  ;;  %p3909_p5 = pnand %p2755_p2, %p3872_p4  ;;  %s3913_s16 = int_to_ptr.vmem [resolvable:$true] %s589_s16 }
 0x173   : > { %s579_s25 = scalar_lea.sflag [#allocation6], %s578_s21 }
 0x174   : > { %p3280_p7 = pneg %p3909_p5 }
 0x177   : > { %s3905_s17 = scalar_lea.hbm %s4275_s26, %s2447_s1  ;;  %s3283_s18 = scalar_lea.hbm %s4275_s26, 256 }
 0x178   : > { %s3278_s2 = scalar_lea.hbm %s3905_s17, 128  ;;  %p3284_p4 = scmp.lt.u32.totalorder %s3905_s17, %s4275_s26 }
 0x179   : > { %p3279_p8 = scmp.ne.s32.totalorder %s3905_s17, %s3278_s2  ;;  %p3285_p6 = scmp.lt.u32.totalorder %s3283_s18, %s3278_s2 }
 0x17a   : > { %p3287_p10 = scmp.lt.u32.totalorder %s3278_s2, %s3905_s17 }
 0x17b   : > { %p3281_p9 = pnand %p3280_p7, %p3279_p8  ;;  %p3286_p3 = por %p3285_p6, %p3284_p4 }
 0x17d   : > { %p3282_p1 = pneg %p3281_p9  ;;  %p3288_p13 = por %p3287_p10, %p3286_p3 }
 0x17f   : > { %p3289_p2 = pnand %p3288_p13, %p3282_p1 }
 0x181   : > { %3292 = shalt.err (!%p3289_p2)
}
 0x182   : > { %s3293_s21 = scalar_lea.vmem %s3913_s16, 128  ;;  %s3436_s15 = smov [#allocation5]  }
 0x183   : > { %p3294_p8 = scmp.ne.s32.totalorder %s3913_s16, %s3293_s21  ;;  %s3298_s1 = sshll.u32 %s3436_s15, 4  ;;  %s3299_s1 = int_to_ptr.vmem [resolvable:$false] %s3298_s1 }
 0x184   : > { %s3300_s20 = scalar_lea.vmem %s3299_s1, 256  ;;  %p3301_p12 = scmp.lt.s32.totalorder %s3913_s16, %s3299_s1 }
 0x185   : > { %p3296_p9 = pnand %p3294_p8, %p3280_p7  ;;  %p3302_p4 = scmp.lt.s32.totalorder %s3300_s20, %s3293_s21 }
 0x187   : > { %p3297_p0 = pneg %p3296_p9  ;;  %p3303_p6 = por %p3302_p4, %p3301_p12 }
 0x189   : > { %p3304_p3 = pnand %p3303_p6, %p3297_p0 }
 0x18b   : > { %3307 = shalt.err (!%p3304_p3)
}
 0x18c   : > { %2736 = dma.hbm_to_vmem [thread:$0]  (!%p3909_p5), %s3905_s17, 128, %s3913_s16, %s579_s25  }
 0x18d   : > { %s4277_s2 = sld [smem:[#allocation44_spill]] }
 0x193   : > { %p4278_p1 = scmp.ne.s32.totalorder %s4277_s2, 0 }
 0x194   : > { %s4279_s18 = sld [smem:[#allocation40_spill]] (!%p4278_p1) }
 0x195   : > { %598 = sbr.rel (%p4278_p1) target bundleno = 2666 (0xa6a), region = 80 }
 0x19a   : > { %s3943_s3 = sand.u32 (!%p4278_p1), 1, %s4279_s18  }
 0x19b   : > { %s2449_s29 = sshll.u32 (!%p4278_p1), %s3943_s3, 3  ;;  %s601_s21 = scalar_lea.sflag (!%p4278_p1), [#allocation6], %s3943_s3 }
 0x19c   : > { %s604_s15 = scalar_lea.vmem [#allocation5], %s2449_s29 }
 0x19d   : > { %3361 = dma.done.wait (%p3884_p11), %s601_s21, 128  }
 0x19e   : > { %3363 = vsyncadd (%p3884_p11), %s601_s21, 4294967168  ;;  %s4280_s17 = sld [smem:[#allocation43_spill]] }
 0x1a4   : > { %p4281_p12 = scmp.ne.s32.totalorder %s4280_s17, 0 }
 0x1a6   : > { %3365 = dma.done.wait (%p4281_p12), [#allocation9], 32  }
 0x1a7   : > { %3367 = vsyncadd (%p4281_p12), [#allocation9], 4294967264 }
 0x1a8   : > { %3369 = dma.done.wait (%p4281_p12), [#allocation12], 272  }
 0x1a9   : > { %3371 = vsyncadd (%p4281_p12), [#allocation12], 4294967024 }
 0x1aa   : > { %3373 = dma.done.wait (%p4281_p12), [#allocation15], 272  }
 0x1ab   : > { %3375 = vsyncadd (%p4281_p12), [#allocation15], 4294967024 }
 0x1ac   : > { %3377 = dma.done.wait (%p4281_p12), [#allocation18], 272  }
 0x1ad   : > { %3379 = vsyncadd (%p4281_p12), [#allocation18], 4294967024 }
 0x1ae   : > { %3381 = dma.done.wait (%p4281_p12), [#allocation21], 272  }
 0x1af   : > { %3383 = vsyncadd (%p4281_p12), [#allocation21], 4294967024 }
 0x1b0   : > { %3385 = dma.done.wait (%p4281_p12), [#allocation24], 32  }
 0x1b1   : > { %3387 = vsyncadd (%p4281_p12), [#allocation24], 4294967264 }
 0x1b2   : > { %3389 = dma.done.wait (%p4281_p12), [#allocation27], 272  }
 0x1b3   : > { %3391 = vsyncadd (%p4281_p12), [#allocation27], 4294967024  ;;  %v3437_v0 = vmov 0.0   ;;  %vm715_vm0 = vcmask 261120   ;;  %v3983_v1 = vld [vmem:[%s604_s15] sm:$0xff]  ;;  %v2847_v14 = vld [vmem:[#allocation17] sm:$0xff]   ;;  %v997_v61 = vlaneseq }
 0x1b4   : > { %2542 = vmatprep.subr.bf16.mxu0 %v3437_v0  ;;  %2550 = vmatprep.subr.bf16.mxu1 %v3437_v0  ;;  %v716_v2 = vsel %vm715_vm0, %v3983_v1, 0.0  ;;  %v2846_v13 = vld [vmem:[#allocation14] sm:$0xff]   ;;  %v2848_v15 = vld [vmem:[#allocation14 + $0x8] sm:$0xff]   ;;  %vm3438_vm1 = vmmov 0   ;;  %v2851_v34 = vld [vmem:[#allocation11 + $0x8] sm:$0xff]   ;;  %vm875_vm2 = vcmask 257024  }
 0x1b5   : > { %717 = vadd.xlane.f32.xlu0 %v716_v2  ;;  %2543 = vmatpush3.bf16.msra.mxu0 %v2846_v13  ;;  %v2849_v16 = vld [vmem:[#allocation17 + $0x8] sm:$0xff]   ;;  %v2465_v24 = vld [vmem:[#allocation8] ss:$0 sm:$0xff]  ;;  %v2466_v26 = vld [vmem:[#allocation10] ss:$0 sm:$0xff]  ;;  %s3439_s27 = smov 120  }
 0x1b6   : > { %2551 = vmatpush3.bf16.msra.mxu1 %v2847_v14  ;;  %2544 = vmatprep.subr.bf16.mxu0 %v3437_v0  ;;  %v2850_v31 = vld [vmem:[#allocation11] sm:$0xff]   ;;  %v2471_v38 = vld [vmem:[#allocation19] ss:$0 sm:$0xff]  ;;  %v2477_v55 = vld [vmem:[#allocation13] ss:$0 sm:$0xff]  ;;  %s3440_s16 = smov 112  }
 0x1b7   : > { %2552 = vmatprep.subr.bf16.mxu1 %v3437_v0  ;;  %2546 = vmatprep.mubr.msk.bf16.mxu0 %vm3438_vm1, %v3437_v0  ;;  %v2467_v37 = vld [vmem:[#allocation16] ss:$0 sm:$0xff]  ;;  %s3441_s24 = smov 104   ;;  %v3442_v59 = vmov 1983009808   ;;  %v998_v63 = vshrl.u32 %v997_v61, 7 }
 0x1b8   : > { %2554 = vmatprep.mubr.msk.bf16.mxu1 %vm3438_vm1, %v3437_v0  ;;  %v995_v60 = vunpack.c.l.s4 %v3442_v59  ;;  %vm1432_vm3 = vcmask 64512   ;;  %vm1684_vm4 = vcmask 1043456   ;;  %s3445_s25 = smov 16   ;;  %s3446_s1 = smov 8   ;;  %vm2027_vm5 = vcmask 130048  }
 0x1b9   : > { %888 = vadd.xlane.f32.xlu0 %v716_v2  ;;  %2545 = vmatpush3.bf16.msra.mxu0 %v2848_v15  ;;  %v3443_v2 = vmov 1934713408   ;;  %s3447_s20 = smov 24   ;;  %vm2029_vm6 = vcmask 195584   ;;  %s4282_s2 = sld [smem:[#allocation42_spill]] }
 0x1ba   : > { %2553 = vmatpush3.bf16.msra.mxu1 %v2849_v16  ;;  %2558 = vmatprep.subr.bf16.mxu0 %v3437_v0  ;;  %v996_v62 = vunpack.c.0.s8 %v995_v60  ;;  %s706_s21 = scalar_lea.vmem [#allocation29], %s2449_s29  ;;  %p4284_p0 = scmp.ne.s32.totalorder %s4273_s0, 0 }
 0x1bb   : > { %2566 = vmatprep.subr.bf16.mxu1 %v3437_v0  ;;  %s2213_s15 = sshll.u32 %s706_s21, 4  ;;  %s4171_s15 = int_to_ptr.vmem [resolvable:$true] %s2213_s15 }
 0x1bc   : > { %s3308_s29 = scalar_lea.vmem %s4171_s15, 128 }
 0x1bd   : > { %p3309_p11 = scmp.ne.s32.totalorder %s4171_s15, %s3308_s29 }
 0x1bf   : > { %s2508_s18 = sshll.u32 %s4282_s2, 7  ;;  %p3310_p5 = pnand %p3309_p11, %p4284_p0 }
 0x1c1   : > { %p3311_p7 = pneg %p3310_p5 }
 0x242   : > { %v718_v3 = vpop.xlane.xlu0 %717 }
 0x243   : > { %v720_v4 = vmul.f32 0.03125, %v718_v3  ;;  %v1027_v3 = vunpack.c.l.s4 %v3443_v2 }
 0x245   : > { %v721_v5 = vsub.f32 %v3983_v1, %v720_v4 }
 0x246   : > { %v889_v6 = vpop.xlane.xlu0 %888 }
 0x247   : > { %v891_v7 = vmul.f32 0.03125, %v889_v6  ;;  %v722_v8 = vmul.f32 %v721_v5, %v721_v5 }
 0x249   : > { %v892_v9 = vsub.f32 %v3983_v1, %v891_v7  ;;  %v723_v10 = vsel %vm715_vm0, %v722_v8, 0.0  ;;  %v4017_v7 = vsub.s32 %v996_v62, %v998_v63 }
 0x24a   : > { %724 = vadd.xlane.f32.xlu1 %v723_v10  ;;  %v1028_v10 = vunpack.c.0.s8 %v1027_v3 }
 0x24b   : > { %v893_v11 = vmul.f32 %v892_v9, %v892_v9 }
 0x24d   : > { %v894_v12 = vsel %vm715_vm0, %v893_v11, 0.0 }
 0x24e   : > { %895 = vadd.xlane.f32.xlu1 %v894_v12 }
 0x2d7   : > { %v725_v17 = vpop.xlane.xlu1 %724 }
 0x2d8   : > { %v726_v18 = vmul.f32 0.03125, %v725_v17  ;;  %v4020_v17 = vsub.s32 %v1028_v10, %v998_v63 }
 0x2da   : > { %v727_v19 = vadd.f32 1e-05, %v726_v18 }
 0x2db   : > { %v896_v20 = vpop.xlane.xlu1 %895 }
 0x2dc   : > { %2856 = vrsqrt.f32 %v727_v19  ;;  %v897_v21 = vmul.f32 0.03125, %v896_v20 }
 0x2de   : > { %v898_v22 = vadd.f32 1e-05, %v897_v21 }
 0x2e0   : > { %2858 = vrsqrt.f32 %v898_v22 }
 0x2e6   : > { %v2857_v23 = vpop.eup %2856 }
 0x2e7   : > { %v729_v25 = vmul.f32 %v2857_v23, %v721_v5 }
 0x2e9   : > { %v736_v27 = vmul.f32 %v2465_v24, %v729_v25 }
 0x2ea   : > { %v2859_v28 = vpop.eup %2858 }
 0x2eb   : > { %v900_v29 = vmul.f32 %v2859_v28, %v892_v9  ;;  %v743_v30 = vadd.f32 %v2466_v26, %v736_v27 }
 0x2ed   : > { %v744_v32 = vpack.c.bf16 %v743_v30, %v743_v30  ;;  %v907_v33 = vmul.f32 %v2465_v24, %v900_v29 }
 0x2ef   : > { %2547 = vmatmul.mubr.msk.bf16.vlgmr.msra.gmra.mrb[0].mxu0 %vm715_vm0, %v744_v32  ;;  %2555 = vmatmul.mubr.msk.bf16.vlgmr.msra.gmra.mrb[0].mxu1 %vm715_vm0, %v744_v32  ;;  %v914_v35 = vadd.f32 %v2466_v26, %v907_v33 }
 0x2f0   : > { %2559 = vmatpush3.bf16.msra.mxu0 %v2850_v31  ;;  %2562 = vmatprep.mubr.msk.bf16.mxu0 %vm3438_vm1, %v3437_v0 }
 0x2f1   : > { %2560 = vmatprep.subr.bf16.mxu0 %v3437_v0  ;;  %2568 = vmatprep.mubr.msk.bf16.mxu1 %vm3438_vm1, %v3437_v0  ;;  %v915_v36 = vpack.c.bf16 %v914_v35, %v914_v35 }
 0x2f4   : > { %2561 = vmatpush3.bf16.msra.mxu0 %v2851_v34 }
 0x2f5   : > { %2572 = vmatprep.subr.bf16.mxu0 %v3437_v0 }
 0x2f7   : > { %2563 = vmatmul.mubr.msk.bf16.vlgmr.msra.gmra.mrb[4].mxu0 %vm715_vm0, %v915_v36 }
 0x2f8   : > { %2574 = vmatprep.mubr.msk.bf16.mxu0 %vm3438_vm1, %v3437_v0 }
 0x3c2   : > { %v805_v39 = vpop.f32.mrb[0].mxu0  ;;  %v868_v40 = vpop.f32.mrb[0].mxu1 }
 0x3c3   : > { %v806_v41 = vadd.f32 %v2467_v37, %v805_v39  ;;  %v869_v42 = vadd.f32 %v2471_v38, %v868_v40  ;;  %v2548_v43 = vpop.f32.mrb[1].mxu0  ;;  %v2556_v44 = vpop.f32.mrb[1].mxu1 }
 0x3c4   : > { %v808_v45 = vpop.f32.mrb[2].mxu0  ;;  %v871_v46 = vpop.f32.mrb[2].mxu1 }
 0x3c5   : > { %v874_v47 = vpack.c.bf16 %v806_v41, %v806_v41  ;;  %v877_v48 = vpack.c.bf16 %v869_v42, %v869_v42  ;;  %v2549_v49 = vpop.f32.mrb[3].mxu0  ;;  %v2557_v50 = vpop.f32.mrb[3].mxu1 }
 0x3c7   : > { %876 = vst.msk [vmem:[#allocation2] sm:$0xf] %vm875_vm2, %v874_v47  ;;  %878 = vst.msk [vmem:[#allocation3] sm:$0xf] %vm875_vm2, %v877_v48 }
 0x3ca   : > { %v976_v51 = vpop.f32.mrb[4].mxu0 }
 0x3cb   : > { %v2564_v52 = vpop.f32.mrb[5].mxu0  ;;  %v977_v57 = vadd.f32 %v2477_v55, %v976_v51 }
 0x3cc   : > { %v979_v53 = vpop.f32.mrb[6].mxu0 }
 0x3cd   : > { %v2565_v54 = vpop.f32.mrb[7].mxu0 }
 0x3ce   : > { %v1132_v56 = vld [vmem:[#allocation2] sm:$0xf]  ;;  %v4013_v58 = vld [vmem:[#allocation3] sm:$0xf] }
 0x3cf   : > { %1135 = vrot.lane.b32.xlu0 %v1132_v56, %s3439_s27  ;;  %1137 = vrot.lane.b32.xlu1 %v1132_v56, %s3440_s16  ;;  %v1144_v8 = vshrl.u32 %v1132_v56, 16 }
 0x3d3   : > { %1139 = vrot.lane.b32.xlu1 %v1132_v56, %s3441_s24  ;;  %986 = vrot.lane.b32.xlu0 %v977_v57, %s3440_s16 }
 0x3d7   : > { %1284 = vrot.lane.b32.xlu0 %v4013_v58, %s3439_s27  ;;  %983 = vrot.lane.b32.xlu1 %v977_v57, %s3439_s27 }
 0x3db   : > { %989 = vrot.lane.b32.xlu1 %v977_v57, %s3441_s24 }
 0x441   : > { %v1138_v4 = vpop.permute.xlu1 %1137  ;;  %v1136_v5 = vpop.permute.xlu0 %1135 }
 0x442   : > { %v1145_v6 = vshrl.u32 %v1136_v5, 16  ;;  %v1143_v9 = vpack.i.b16 %v1136_v5, %v1132_v56  ;;  %v1150_v12 = vshrl.u32 %v1138_v4, 16 }
 0x444   : > { %v1146_v13 = vpack.i.b16 %v1145_v6, %v1144_v8  ;;  %v1160_v16 = vrot.slane %v1143_v9, %v4017_v7  ;;  %v3444_v8 = vmov 0  }
 0x445   : > { %v1140_v11 = vpop.permute.xlu1 %1139  ;;  %v987_v25 = vpop.permute.xlu0 %986 }
 0x446   : > { %v1149_v14 = vpack.i.b16 %v1140_v11, %v1138_v4  ;;  %v1151_v15 = vshrl.u32 %v1140_v11, 16  ;;  %v1194_v21 = vrot.slane %v1146_v13, %v4017_v7  ;;  %v992_v30 = vcombine.low %v977_v57, %v987_v25 }
 0x447   : > { %v993_v31 = vcombine.high %v977_v57, %v987_v25 }
 0x448   : > { %v1152_v18 = vpack.i.b16 %v1151_v15, %v1150_v12  ;;  %v1168_v19 = vrot.slane %v1149_v14, %v4017_v7  ;;  %v1000_v43 = vrot.slane %v992_v30, %v4017_v7 }
 0x449   : > { %v984_v20 = vpop.permute.xlu1 %983  ;;  %v1007_v44 = vrot.slane %v993_v31, %v4017_v7 }
 0x44a   : > { %v1169_v22 = vcombine.low %v1160_v16, %v1168_v19  ;;  %v1170_v23 = vcombine.high %v1160_v16, %v1168_v19  ;;  %v1202_v24 = vrot.slane %v1152_v18, %v4017_v7 }
 0x44c   : > { %v1177_v26 = vrot.slane %v1169_v22, %v4020_v17  ;;  %v1184_v27 = vrot.slane %v1170_v23, %v4020_v17  ;;  %v1203_v28 = vcombine.low %v1194_v21, %v1202_v24  ;;  %v1204_v29 = vcombine.high %v1194_v21, %v1202_v24 }
 0x44d   : > { %v990_v32 = vpop.permute.xlu1 %989 }
 0x44e   : > { %v1211_v33 = vrot.slane %v1203_v28, %v4020_v17  ;;  %v1218_v34 = vrot.slane %v1204_v29, %v4020_v17  ;;  %v1221_v35 = vcombine.low %v1177_v26, %v1184_v27  ;;  %v2483_v36 = vcombine.high %v1177_v26, %v1184_v27 }
 0x44f   : > { %v1008_v37 = vcombine.low %v984_v20, %v990_v32  ;;  %v1009_v38 = vcombine.high %v984_v20, %v990_v32 }
 0x450   : > { %v1228_v39 = vrot.slane %v1221_v35, %v4017_v7  ;;  %v1236_v40 = vrot.slane %v2483_v36, %v4017_v7  ;;  %v1246_v41 = vcombine.low %v1211_v33, %v1218_v34  ;;  %v2484_v42 = vcombine.high %v1211_v33, %v1218_v34 }
 0x451   : > { %v1016_v45 = vrot.slane %v1008_v37, %v4017_v7  ;;  %v1023_v46 = vrot.slane %v1009_v38, %v4017_v7 }
 0x452   : > { %v1253_v47 = vrot.slane %v1246_v41, %v4017_v7  ;;  %v1261_v48 = vrot.slane %v2484_v42, %v4017_v7  ;;  %v1237_v49 = vcombine.low %v1228_v39, %v1236_v40 }
 0x453   : > { %v1024_v50 = vcombine.low %v1000_v43, %v1016_v45  ;;  %v1025_v51 = vcombine.high %v1000_v43, %v1016_v45  ;;  %v1040_v52 = vcombine.low %v1007_v44, %v1023_v46  ;;  %v1041_v53 = vcombine.high %v1007_v44, %v1023_v46 }
 0x454   : > { %v1244_v54 = vrot.slane %v1237_v49, %v4020_v17  ;;  %v1262_v55 = vcombine.low %v1253_v47, %v1261_v48 }
 0x455   : > { %v1032_v56 = vrot.slane %v1024_v50, %v4020_v17  ;;  %v1039_v57 = vrot.slane %v1025_v51, %v4020_v17  ;;  %v1048_v59 = vrot.slane %v1040_v52, %v4020_v17  ;;  %v1055_v60 = vrot.slane %v1041_v53, %v4020_v17 }
 0x456   : > { %v1269_v61 = vrot.slane %v1262_v55, %v4020_v17  ;;  %v1274_v5 = vshrl.u32 %v1244_v54, 16  ;;  %v1245_v16 = vcombine.high %v1244_v54, %v3444_v8 }
 0x457   : > { %v1060_v62 = vcombine.low %v1032_v56, %v1039_v57  ;;  %v2481_v63 = vcombine.high %v1032_v56, %v1039_v57  ;;  %v1076_v2 = vcombine.low %v1048_v59, %v1055_v60  ;;  %v2482_v3 = vcombine.high %v1048_v59, %v1055_v60 }
 0x458   : > { %v1273_v4 = vpack.i.b16 %v1269_v61, %v1244_v54  ;;  %v1275_v6 = vshrl.u32 %v1269_v61, 16  ;;  %v1270_v9 = vcombine.high %v1269_v61, %v3444_v8  ;;  %v1280_v26 = vshrl.u32 %v1245_v16, 16 }
 0x459   : > { %v1067_v10 = vrot.slane %v1060_v62, %v4017_v7  ;;  %v1075_v11 = vrot.slane %v2481_v63, %v4017_v7  ;;  %v1083_v12 = vrot.slane %v1076_v2, %v4017_v7  ;;  %v1091_v13 = vrot.slane %v2482_v3, %v4017_v7  ;;  %v1285_v62 = vpop.permute.xlu0 %1284 }
 0x45a   : > { %v1437_v14 = vsel %vm1432_vm3, %v1273_v4, 0  ;;  %v1276_v15 = vpack.i.b16 %v1275_v6, %v1274_v5  ;;  %v1281_v21 = vshrl.u32 %v1270_v9, 16  ;;  %v1279_v28 = vpack.i.b16 %v1270_v9, %v1245_v16 }
 0x45b   : > { %v1092_v18 = vcombine.low %v1067_v10, %v1075_v11  ;;  %v1108_v19 = vcombine.low %v1083_v12, %v1091_v13  ;;  %2567 = vmatpush3.bf16.xpose.msra.mxu1 %v1437_v14  ;;  %v1093_v22 = vcombine.high %v1067_v10, %v1075_v11  ;;  %v1109_v23 = vcombine.high %v1083_v12, %v1091_v13 }
 0x45c   : > { %v1483_v20 = vsel %vm1432_vm3, %v1276_v15, 0  ;;  %2578 = vmatprep.subr.bf16.mxu1 %v3437_v0  ;;  %v1282_v30 = vpack.i.b16 %v1281_v21, %v1280_v26  ;;  %v1529_v35 = vsel %vm1432_vm3, %v1279_v28, 0  ;;  %v1294_v2 = vshrl.u32 %v1285_v62, 16 }
 0x45d   : > { %2573 = vmatpush3.bf16.xpose.msra.mxu0 %v1483_v20  ;;  %v1100_v24 = vrot.slane %v1092_v18, %v4020_v17  ;;  %v1116_v25 = vrot.slane %v1108_v19, %v4020_v17  ;;  %v1107_v32 = vrot.slane %v1093_v22, %v4020_v17  ;;  %v1123_v33 = vrot.slane %v1109_v23, %v4020_v17 }
 0x45e   : > { %2584 = vmatprep.subr.bf16.mxu0 %v3437_v0  ;;  %v1575_v36 = vsel %vm1432_vm3, %v1282_v30, 0  ;;  %v1293_v6 = vshrl.u32 %v4013_v58, 16  ;;  %v1292_v10 = vpack.i.b16 %v1285_v62, %v4013_v58 }
 0x45f   : > { %v1124_v27 = vcombine.low %v1100_v24, %v1116_v25  ;;  %v1125_v29 = vcombine.high %v1100_v24, %v1116_v25  ;;  %v1126_v37 = vcombine.low %v1107_v32, %v1123_v33  ;;  %v1127_v38 = vcombine.high %v1107_v32, %v1123_v33 }
 0x460   : > { %v1295_v13 = vpack.i.b16 %v1294_v2, %v1293_v6  ;;  %v1309_v19 = vrot.slane %v1292_v10, %v4017_v7 }
 0x461   : > { %v1128_v31 = vpack.c.bf16 %v1124_v27, %v1124_v27  ;;  %v1129_v34 = vpack.c.bf16 %v1125_v29, %v1125_v29  ;;  %v1130_v39 = vpack.c.bf16 %v1126_v37, %v1126_v37  ;;  %v1131_v40 = vpack.c.bf16 %v1127_v38, %v1127_v38 }
 0x462   : > { %v1343_v22 = vrot.slane %v1295_v13, %v4017_v7 }
 0x463   : > { %2569 = vmatmul.mubr.msk.bf16.vlgmr.msra.gmra.mrb[4].mxu1 %vm1432_vm3, %v1128_v31 }
 0x464   : > { %2579 = vmatpush3.bf16.xpose.msra.mxu1 %v1529_v35  ;;  %2575 = vmatmul.mubr.msk.bf16.vlgmr.msra.gmra.mrb[8].mxu0 %vm1432_vm3, %v1129_v34 }
 0x465   : > { %2585 = vmatpush3.bf16.xpose.msra.mxu0 %v1575_v36  ;;  %2580 = vmatprep.mubr.msk.bf16.mxu1 %vm3438_vm1, %v3437_v0 }
 0x466   : > { %2586 = vmatprep.mubr.msk.bf16.mxu0 %vm3438_vm1, %v3437_v0  ;;  %2590 = vmatprep.subr.bf16.mxu1 %v3437_v0 }
 0x467   : > { %2596 = vmatprep.subr.bf16.mxu0 %v3437_v0 }
 0x46b   : > { %2581 = vmatmul.mubr.msk.bf16.vlgmr.msra.gmra.mrb[8].mxu1 %vm1432_vm3, %v1130_v39 }
 0x46c   : > { %2587 = vmatmul.mubr.msk.bf16.vlgmr.msra.gmra.mrb[12].mxu0 %vm1432_vm3, %v1131_v40  ;;  %2592 = vmatprep.mubr.msk.bf16.mxu1 %vm3438_vm1, %v3437_v0 }
 0x46d   : > { %2598 = vmatprep.mubr.msk.bf16.mxu0 %vm3438_vm1, %v3437_v0 }
 0x536   : > { %v1473_v41 = vpop.f32.mrb[4].mxu1 }
 0x537   : > { %v2570_v42 = vpop.f32.mrb[5].mxu1  ;;  %v1519_v43 = vpop.f32.mrb[8].mxu0  ;;  %v1617_v44 = vsel %vm1432_vm3, %v1473_v41, -inf }
 0x538   : > { %1618 = vmax.xlane.f32.xlu0 %v1617_v44  ;;  %v1476_v45 = vpop.f32.mrb[6].mxu1  ;;  %v2576_v46 = vpop.f32.mrb[9].mxu0  ;;  %v1620_v47 = vsel %vm1432_vm3, %v1519_v43, -inf }
 0x539   : > { %v2571_v48 = vpop.f32.mrb[7].mxu1  ;;  %1621 = vmax.xlane.f32.xlu1 %v1620_v47  ;;  %v1522_v49 = vpop.f32.mrb[10].mxu0 }
 0x53a   : > { %v2577_v50 = vpop.f32.mrb[11].mxu0 }
 0x53e   : > { %v4075_v51 = vpop.f32.mrb[8].mxu1 }
 0x53f   : > { %v2582_v52 = vpop.f32.mrb[9].mxu1  ;;  %v4077_v53 = vpop.f32.mrb[12].mxu0  ;;  %v1623_v61 = vsel %vm1432_vm3, %v4075_v51, -inf }
 0x540   : > { %v1568_v54 = vpop.f32.mrb[10].mxu1  ;;  %v2588_v55 = vpop.f32.mrb[13].mxu0  ;;  %v1626_v60 = vsel %vm1432_vm3, %v4077_v53, -inf }
 0x541   : > { %v2583_v56 = vpop.f32.mrb[11].mxu1  ;;  %v1614_v57 = vpop.f32.mrb[14].mxu0 }
 0x542   : > { %v2589_v59 = vpop.f32.mrb[15].mxu0 }
 0x54a   : > { %1286 = vrot.lane.b32.xlu1 %v4013_v58, %s3440_s16  ;;  %s4283_s16 = sld [smem:[#allocation49_spill]] }
 0x54e   : > { %1288 = vrot.lane.b32.xlu0 %v4013_v58, %s3441_s24 }
 0x550   : > { %s4169_s24 = scalar_lea.hbm %s4283_s16, %s2508_s18 }
 0x56d   : > { %1627 = vmax.xlane.f32.xlu0 %v1626_v60 }
 0x56e   : > { %1624 = vmax.xlane.f32.xlu1 %v1623_v61 }
 0x5c5   : > { %v4087_v63 = vpop.xlane.xlu0 %1618 }
 0x5c6   : > { %v1641_v3 = vsub.f32 %v1473_v41, %v4087_v63  ;;  %v4090_v4 = vpop.xlane.xlu1 %1621 }
 0x5c7   : > { %v1642_v5 = vsub.f32 %v1519_v43, %v4090_v4 }
 0x5c8   : > { %v1645_v9 = vmul.f32 1.442695, %v1641_v3 }
 0x5c9   : > { %v1647_v11 = vmul.f32 1.442695, %v1642_v5  ;;  %v1289_v12 = vpop.permute.xlu0 %1288 }
 0x5ca   : > { %v1287_v14 = vpop.permute.xlu1 %1286  ;;  %2860 = vpow2.f32 %v1645_v9  ;;  %v1300_v15 = vshrl.u32 %v1289_v12, 16 }
 0x5cb   : > { %v1298_v16 = vpack.i.b16 %v1289_v12, %v1287_v14  ;;  %v1299_v18 = vshrl.u32 %v1287_v14, 16  ;;  %2862 = vpow2.f32 %v1647_v11 }
 0x5cd   : > { %v1301_v20 = vpack.i.b16 %v1300_v15, %v1299_v18  ;;  %v1317_v21 = vrot.slane %v1298_v16, %v4017_v7 }
 0x5cf   : > { %v1318_v23 = vcombine.low %v1309_v19, %v1317_v21  ;;  %v1319_v24 = vcombine.high %v1309_v19, %v1317_v21  ;;  %v1351_v58 = vrot.slane %v1301_v20, %v4017_v7 }
 0x5d1   : > { %v1326_v25 = vrot.slane %v1318_v23, %v4020_v17  ;;  %v1333_v26 = vrot.slane %v1319_v24, %v4020_v17  ;;  %v1352_v27 = vcombine.low %v1343_v22, %v1351_v58  ;;  %v1353_v28 = vcombine.high %v1343_v22, %v1351_v58 }
 0x5d2   : > { %v1629_v22 = vsub.f32 -inf, %v4087_v63  ;;  %v1630_v23 = vsub.f32 -inf, %v4090_v4 }
 0x5d3   : > { %v1360_v29 = vrot.slane %v1352_v27, %v4020_v17  ;;  %v1367_v30 = vrot.slane %v1353_v28, %v4020_v17  ;;  %v1370_v31 = vcombine.low %v1326_v25, %v1333_v26  ;;  %v2485_v32 = vcombine.high %v1326_v25, %v1333_v26 }
 0x5d4   : > { %v2861_v33 = vpop.eup %2860  ;;  %v1633_v24 = vmul.f32 1.442695, %v1629_v22  ;;  %v1635_v58 = vmul.f32 1.442695, %v1630_v23  ;;  %v2852_v22 = vld [vmem:[#allocation20] sm:$0xff]  }
 0x5d5   : > { %v1377_v34 = vrot.slane %v1370_v31, %v4017_v7  ;;  %v1385_v35 = vrot.slane %v2485_v32, %v4017_v7  ;;  %v1395_v36 = vcombine.low %v1360_v29, %v1367_v30  ;;  %v2486_v37 = vcombine.high %v1360_v29, %v1367_v30  ;;  %v2863_v39 = vpop.eup %2862 }
 0x5d6   : > { %v1653_v38 = vpack.c.bf16 %v2861_v33, %v2861_v33  ;;  %v1654_v44 = vpack.c.bf16 %v2863_v39, %v2863_v39 }
 0x5d7   : > { %v1402_v40 = vrot.slane %v1395_v36, %v4017_v7  ;;  %v1410_v41 = vrot.slane %v2486_v37, %v4017_v7  ;;  %v1386_v42 = vcombine.low %v1377_v34, %v1385_v35 }
 0x5d8   : > { %v1661_v43 = vunpack.c.l.bf16 %v1653_v38  ;;  %v1662_v48 = vunpack.c.l.bf16 %v1654_v44 }
 0x5d9   : > { %v1393_v45 = vrot.slane %v1386_v42, %v4020_v17  ;;  %v1411_v46 = vcombine.low %v1402_v40, %v1410_v41 }
 0x5da   : > { %v1665_v47 = vsel %vm1432_vm3, %v1661_v43, 0.0  ;;  %v1668_v57 = vsel %vm1432_vm3, %v1662_v48, 0.0 }
 0x5db   : > { %1666 = vadd.xlane.f32.xlu0 %v1665_v47  ;;  %v1418_v49 = vrot.slane %v1411_v46, %v4020_v17  ;;  %v1394_v50 = vcombine.high %v1393_v45, %v3444_v8  ;;  %v1423_v54 = vshrl.u32 %v1393_v45, 16 }
 0x5dd   : > { %v1422_v52 = vpack.i.b16 %v1418_v49, %v1393_v45  ;;  %v1424_v55 = vshrl.u32 %v1418_v49, 16  ;;  %v1419_v56 = vcombine.high %v1418_v49, %v3444_v8  ;;  %v1429_v59 = vshrl.u32 %v1394_v50, 16 }
 0x5df   : > { %1669 = vadd.xlane.f32.xlu0 %v1668_v57  ;;  %v1686_v60 = vsel %vm1684_vm4, %v1422_v52, 0  ;;  %v1425_v61 = vpack.i.b16 %v1424_v55, %v1423_v54  ;;  %v1428_v62 = vpack.i.b16 %v1419_v56, %v1394_v50  ;;  %v1430_v2 = vshrl.u32 %v1419_v56, 16 }
 0x5e0   : > { %2591 = vmatpush3.bf16.msra.mxu1 %v1686_v60 }
 0x5e1   : > { %v1732_v3 = vsel %vm1684_vm4, %v1425_v61, 0  ;;  %2602 = vmatprep.subr.bf16.mxu1 %v3437_v0  ;;  %v1431_v5 = vpack.i.b16 %v1430_v2, %v1429_v59  ;;  %v1778_v8 = vsel %vm1684_vm4, %v1428_v62, 0 }
 0x5e2   : > { %2597 = vmatpush3.bf16.msra.mxu0 %v1732_v3 }
 0x5e3   : > { %2593 = vmatmul.mubr.msk.bf16.vlgmr.msra.gmra.mrb[12].mxu1 %vm1432_vm3, %v1653_v38  ;;  %2608 = vmatprep.subr.bf16.mxu0 %v3437_v0  ;;  %v1824_v6 = vsel %vm1684_vm4, %v1431_v5, 0 }
 0x5e4   : > { %2603 = vmatpush3.bf16.msra.mxu1 %v1778_v8  ;;  %2604 = vmatprep.mubr.msk.bf16.mxu1 %vm3438_vm1, %v3437_v0 }
 0x5e5   : > { %2599 = vmatmul.mubr.msk.bf16.vlgmr.msra.gmra.mrb[16].mxu0 %vm1432_vm3, %v1654_v44  ;;  %2614 = vmatprep.subr.bf16.mxu1 %v3437_v0 }
 0x5e6   : > { %2609 = vmatpush3.bf16.msra.mxu0 %v1824_v6  ;;  %2610 = vmatprep.mubr.msk.bf16.mxu0 %vm3438_vm1, %v3437_v0 }
 0x5e7   : > { %2622 = vmatprep.subr.bf16.mxu0 %v3437_v0 }
 0x5fa   : > { %v1628_v9 = vpop.xlane.xlu0 %1627 }
 0x5fb   : > { %v1644_v10 = vsub.f32 %v4077_v53, %v1628_v9  ;;  %v1625_v11 = vpop.xlane.xlu1 %1624  ;;  %v1632_v45 = vsub.f32 -inf, %v1628_v9 }
 0x5fc   : > { %v1643_v12 = vsub.f32 %v4075_v51, %v1625_v11  ;;  %v1631_v46 = vsub.f32 -inf, %v1625_v11 }
 0x5fd   : > { %v1651_v13 = vmul.f32 1.442695, %v1644_v10  ;;  %v1639_v47 = vmul.f32 1.442695, %v1632_v45 }
 0x5fe   : > { %v1649_v14 = vmul.f32 1.442695, %v1643_v12  ;;  %v1637_v48 = vmul.f32 1.442695, %v1631_v46 }
 0x5ff   : > { %2864 = vpow2.f32 %v1651_v13 }
 0x600   : > { %2866 = vpow2.f32 %v1649_v14 }
 0x601   : > { %2868 = vpow2.f32 %v1633_v24 }
 0x602   : > { %2870 = vpow2.f32 %v1635_v58 }
 0x609   : > { %v2865_v15 = vpop.eup %2864 }
 0x60a   : > { %v1656_v16 = vpack.c.bf16 %v2865_v15, %v2865_v15  ;;  %v2867_v18 = vpop.eup %2866 }
 0x60b   : > { %v1655_v19 = vpack.c.bf16 %v2867_v18, %v2867_v18  ;;  %v2869_v26 = vpop.eup %2868 }
 0x60c   : > { %2611 = vmatmul.mubr.msk.bf16.vlgmr.msra.gmra.mrb[20].mxu0 %vm1432_vm3, %v1656_v16  ;;  %v1664_v20 = vunpack.c.l.bf16 %v1656_v16  ;;  %v2871_v27 = vpop.eup %2870  ;;  %v1657_v28 = vmul.f32 0.0, %v2869_v26 }
 0x60d   : > { %2626 = vmatprep.mubr.msk.bf16.mxu0 %vm3438_vm1, %v3437_v0  ;;  %2605 = vmatmul.mubr.msk.bf16.vlgmr.msra.gmra.mrb[16].mxu1 %vm1432_vm3, %v1655_v19  ;;  %v1663_v21 = vunpack.c.l.bf16 %v1655_v19  ;;  %v1658_v31 = vmul.f32 0.0, %v2871_v27 }
 0x60e   : > { %v1674_v53 = vsel %vm1432_vm3, %v1664_v20, 0.0  ;;  %2618 = vmatprep.mubr.msk.bf16.mxu1 %vm3438_vm1, %v3437_v0  ;;  %2615 = vmatpush3.bf16.msra.mxu1 %v2852_v22 }
 0x60f   : > { %1675 = vadd.xlane.f32.xlu0 %v1674_v53  ;;  %v1671_v51 = vsel %vm1432_vm3, %v1663_v21, 0.0  ;;  %2616 = vmatprep.subr.bf16.mxu1 %v3437_v0 }
 0x610   : > { %1672 = vadd.xlane.f32.xlu1 %v1671_v51 }
 0x668   : > { %v1667_v25 = vpop.xlane.xlu0 %1666 }
 0x669   : > { %v1677_v30 = vadd.f32 %v1667_v25, %v1657_v28 }
 0x66b   : > { %2872 = vrcp.f32 %v1677_v30  ;;  %v2853_v30 = vld [vmem:[#allocation20 + $0x8] sm:$0xff]  }
 0x66c   : > { %v1670_v29 = vpop.xlane.xlu0 %1669  ;;  %2617 = vmatpush3.bf16.msra.mxu1 %v2853_v30 }
 0x66d   : > { %v1678_v32 = vadd.f32 %v1670_v29, %v1658_v31 }
 0x66f   : > { %2874 = vrcp.f32 %v1678_v32 }
 0x670   : > { %2876 = vpow2.f32 %v1639_v47 }
 0x671   : > { %2878 = vpow2.f32 %v1637_v48 }
 0x675   : > { %v2873_v63 = vpop.eup %2872 }
 0x679   : > { %v2875_v41 = vpop.eup %2874 }
 0x67a   : > { %v2877_v49 = vpop.eup %2876 }
 0x67b   : > { %v2879_v50 = vpop.eup %2878  ;;  %v1660_v54 = vmul.f32 0.0, %v2877_v49 }
 0x67c   : > { %v1659_v57 = vmul.f32 0.0, %v2879_v50 }
 0x69c   : > { %v1676_v52 = vpop.xlane.xlu0 %1675 }
 0x69d   : > { %v1673_v55 = vpop.xlane.xlu1 %1672  ;;  %v1680_v56 = vadd.f32 %v1676_v52, %v1660_v54 }
 0x69e   : > { %v1679_v59 = vadd.f32 %v1673_v55, %v1659_v57 }
 0x69f   : > { %2880 = vrcp.f32 %v1680_v56  ;;  %v2497_v56 = vld [vmem:[#allocation22] ss:$0 sm:$0xff] }
 0x6a0   : > { %2882 = vrcp.f32 %v1679_v59 }
 0x6a9   : > { %v2881_v2 = vpop.eup %2880 }
 0x6aa   : > { %v2883_v11 = vpop.eup %2882 }
 0x6b6   : > { %v1722_v33 = vpop.f32.mrb[12].mxu1 }
 0x6b7   : > { %v1866_v34 = vadd.f32 %v1722_v33, %v1657_v28  ;;  %v2594_v35 = vpop.f32.mrb[13].mxu1 }
 0x6b8   : > { %v1725_v36 = vpop.f32.mrb[14].mxu1  ;;  %v1768_v4 = vpop.f32.mrb[16].mxu0 }
 0x6b9   : > { %v1874_v37 = vmul.f32 %v2873_v63, %v1866_v34  ;;  %v1867_v38 = vadd.f32 %v1768_v4, %v1658_v31  ;;  %v2595_v39 = vpop.f32.mrb[15].mxu1  ;;  %v2600_v40 = vpop.f32.mrb[17].mxu0 }
 0x6ba   : > { %v1771_v42 = vpop.f32.mrb[18].mxu0 }
 0x6bb   : > { %v1875_v43 = vmul.f32 %v2875_v41, %v1867_v38  ;;  %v2601_v44 = vpop.f32.mrb[19].mxu0 }
 0x6df   : > { %v1860_v60 = vpop.f32.mrb[20].mxu0 }
 0x6e0   : > { %v1869_v61 = vadd.f32 %v1860_v60, %v1660_v54  ;;  %v2612_v62 = vpop.f32.mrb[21].mxu0  ;;  %v1814_v3 = vpop.f32.mrb[16].mxu1 }
 0x6e1   : > { %v1863_v5 = vpop.f32.mrb[22].mxu0  ;;  %v1868_v6 = vadd.f32 %v1814_v3, %v1659_v57  ;;  %v2606_v9 = vpop.f32.mrb[17].mxu1 }
 0x6e2   : > { %v1877_v8 = vmul.f32 %v2881_v2, %v1869_v61  ;;  %v2613_v10 = vpop.f32.mrb[23].mxu0  ;;  %v1817_v12 = vpop.f32.mrb[18].mxu1 }
 0x6e3   : > { %v1876_v15 = vmul.f32 %v2883_v11, %v1868_v6  ;;  %v2607_v16 = vpop.f32.mrb[19].mxu1  ;;  %v2854_v11 = vld [vmem:[#allocation26] sm:$0xff]   ;;  %v2855_v12 = vld [vmem:[#allocation26 + $0x8] sm:$0xff]  }
 0x6e4   : > { %v1894_v13 = vcombine.low %v1875_v43, %v1877_v8  ;;  %v1895_v14 = vcombine.high %v1875_v43, %v1877_v8  ;;  %2623 = vmatpush3.bf16.msra.mxu0 %v2854_v11  ;;  %v2501_v16 = vld [vmem:[#allocation23] ss:$0 sm:$0xff] }
 0x6e5   : > { %v1878_v18 = vcombine.low %v1874_v37, %v1876_v15  ;;  %v1879_v19 = vcombine.high %v1874_v37, %v1876_v15  ;;  %2624 = vmatprep.subr.bf16.mxu0 %v3437_v0  ;;  %v2506_v0 = vld [vmem:[#allocation28] ss:$0 sm:$0xff] }
 0x6e6   : > { %v1902_v20 = vrot.slane %v1894_v13, %v4017_v7  ;;  %v1909_v53 = vrot.slane %v1895_v14, %v4017_v7 }
 0x6e7   : > { %v1886_v21 = vrot.slane %v1878_v18, %v4017_v7  ;;  %v1893_v51 = vrot.slane %v1879_v19, %v4017_v7  ;;  %v2502_v19 = vld [vmem:[#allocation25] ss:$0 sm:$0xff] }
 0x6e8   : > { %2625 = vmatpush3.bf16.msra.mxu0 %v2855_v12 }
 0x6e9   : > { %v1910_v23 = vcombine.low %v1886_v21, %v1902_v20  ;;  %v1911_v24 = vcombine.high %v1886_v21, %v1902_v20  ;;  %v1926_v58 = vcombine.low %v1893_v51, %v1909_v53  ;;  %v1927_v25 = vcombine.high %v1893_v51, %v1909_v53 }
 0x6eb   : > { %v1918_v26 = vrot.slane %v1910_v23, %v4020_v17  ;;  %v1925_v27 = vrot.slane %v1911_v24, %v4020_v17  ;;  %v1934_v28 = vrot.slane %v1926_v58, %v4020_v17  ;;  %v1941_v29 = vrot.slane %v1927_v25, %v4020_v17 }
 0x6ed   : > { %v1946_v31 = vcombine.low %v1918_v26, %v1925_v27  ;;  %v2495_v32 = vcombine.high %v1918_v26, %v1925_v27  ;;  %v1962_v33 = vcombine.low %v1934_v28, %v1941_v29  ;;  %v2496_v34 = vcombine.high %v1934_v28, %v1941_v29 }
 0x6ef   : > { %v1953_v35 = vrot.slane %v1946_v31, %v4017_v7  ;;  %v1961_v63 = vrot.slane %v2495_v32, %v4017_v7  ;;  %v1969_v36 = vrot.slane %v1962_v33, %v4017_v7  ;;  %v1977_v4 = vrot.slane %v2496_v34, %v4017_v7 }
 0x6f1   : > { %v1979_v37 = vcombine.high %v1953_v35, %v1961_v63  ;;  %v1995_v38 = vcombine.high %v1969_v36, %v1977_v4  ;;  %v1978_v39 = vcombine.low %v1953_v35, %v1961_v63  ;;  %v1994_v40 = vcombine.low %v1969_v36, %v1977_v4 }
 0x6f3   : > { %v1993_v41 = vrot.slane %v1979_v37, %v4020_v17  ;;  %v2009_v42 = vrot.slane %v1995_v38, %v4020_v17  ;;  %v1986_v43 = vrot.slane %v1978_v39, %v4020_v17  ;;  %v2002_v44 = vrot.slane %v1994_v40, %v4020_v17 }
 0x6f5   : > { %v2012_v45 = vcombine.low %v1993_v41, %v2009_v42  ;;  %v2011_v46 = vcombine.high %v1986_v43, %v2002_v44  ;;  %v2013_v47 = vcombine.high %v1993_v41, %v2009_v42  ;;  %v2010_v48 = vcombine.low %v1986_v43, %v2002_v44 }
 0x6f7   : > { %2019 = vrot.lane.b32.xlu0 %v2012_v45, %s3445_s25  ;;  %2015 = vrot.lane.b32.xlu1 %v2011_v46, %s3446_s1  ;;  %s2200_s25 = scalar_lea.sflag [#allocation7], %s3943_s3  ;;  %s3448_s1 = smov [#allocation29]  }
 0x6fb   : > { %2023 = vrot.lane.b32.xlu1 %v2013_v47, %s3447_s20  ;;  %s3312_s20 = sshll.u32 %s3448_s1, 4  ;;  %s3313_s20 = int_to_ptr.vmem [resolvable:$false] %s3312_s20 }
 0x6fc   : > { %s3314_s2 = scalar_lea.vmem %s3313_s20, 256  ;;  %p3315_p10 = scmp.lt.s32.totalorder %s4171_s15, %s3313_s20 }
 0x6fd   : > { %p3316_p13 = scmp.lt.s32.totalorder %s3314_s2, %s3308_s29 }
 0x6ff   : > { %p3317_p2 = por %p3316_p13, %p3315_p10 }
 0x701   : > { %p3318_p8 = pnand %p3317_p2, %p3311_p7 }
 0x769   : > { %v2016_v7 = vpop.permute.xlu1 %2015  ;;  %v2020_v49 = vpop.permute.xlu0 %2019 }
 0x76a   : > { %v2026_v50 = vsel %vm1432_vm3, %v2010_v48, %v2016_v7 }
 0x76b   : > { %v2028_v54 = vsel %vm2027_vm5, %v2026_v50, %v2020_v49 }
 0x76d   : > { %v2024_v52 = vpop.permute.xlu1 %2023 }
 0x76e   : > { %v2030_v55 = vsel %vm2029_vm6, %v2028_v54, %v2024_v52 }
 0x76f   : > { %v2031_v17 = vpack.c.bf16 %v2030_v55, %v2030_v55 }
 0x771   : > { %2619 = vmatmul.mubr.msk.bf16.vlgmr.msra.gmra.mrb[20].mxu1 %vm715_vm0, %v2031_v17 }
 0x844   : > { %v2092_v57 = vpop.f32.mrb[20].mxu1 }
 0x845   : > { %v2093_v59 = vadd.f32 %v2497_v56, %v2092_v57  ;;  %v2620_v60 = vpop.f32.mrb[21].mxu1 }
 0x846   : > { %v2095_v61 = vpop.f32.mrb[22].mxu1 }
 0x847   : > { %v2098_v62 = vadd.f32 %v2093_v59, %v3983_v1  ;;  %v2621_v2 = vpop.f32.mrb[23].mxu1 }
 0x849   : > { %v2101_v3 = vsel %vm715_vm0, %v2098_v62, 0.0 }
 0x84a   : > { %2102 = vadd.xlane.f32.xlu1 %v2101_v3 }
 0x8d7   : > { %v2103_v5 = vpop.xlane.xlu1 %2102 }
 0x8d8   : > { %v2104_v8 = vmul.f32 0.03125, %v2103_v5 }
 0x8da   : > { %v2105_v6 = vsub.f32 %v2098_v62, %v2104_v8 }
 0x8dc   : > { %v2106_v9 = vmul.f32 %v2105_v6, %v2105_v6 }
 0x8de   : > { %v2107_v10 = vsel %vm715_vm0, %v2106_v9, 0.0 }
 0x8df   : > { %2108 = vadd.xlane.f32.xlu0 %v2107_v10 }
 0x96c   : > { %v2109_v1 = vpop.xlane.xlu0 %2108 }
 0x96d   : > { %v2110_v13 = vmul.f32 0.03125, %v2109_v1 }
 0x96f   : > { %v2111_v14 = vadd.f32 1e-05, %v2110_v13 }
 0x971   : > { %2884 = vrsqrt.f32 %v2111_v14 }
 0x97b   : > { %v2885_v15 = vpop.eup %2884 }
 0x97c   : > { %v2113_v18 = vmul.f32 %v2885_v15, %v2105_v6 }
 0x97e   : > { %v2120_v20 = vmul.f32 %v2501_v16, %v2113_v18 }
 0x980   : > { %v2127_v53 = vadd.f32 %v2502_v19, %v2120_v20 }
 0x982   : > { %v2128_v21 = vpack.c.bf16 %v2127_v53, %v2127_v53 }
 0x984   : > { %2627 = vmatmul.mubr.msk.bf16.vlgmr.msra.gmra.mrb[24].mxu0 %vm715_vm0, %v2128_v21 }
 0xa57   : > { %v2182_v51 = vpop.f32.mrb[24].mxu0 }
 0xa58   : > { %v2188_v22 = vadd.f32 %v2182_v51, %v2098_v62  ;;  %v2628_v23 = vpop.f32.mrb[25].mxu0 }
 0xa59   : > { %v2185_v24 = vpop.f32.mrb[26].mxu0 }
 0xa5a   : > { %v2196_v58 = vadd.f32 %v2506_v0, %v2188_v22  ;;  %v2629_v25 = vpop.f32.mrb[27].mxu0 }
 0xa5c   : > { %2198 = vst.msk [vmem:[%s706_s21] sm:$0xff] %vm715_vm0, %v2196_v58 }
 0xa5d   : > { %3321 = shalt.err (!%p3318_p8)
}
 0xa5e   : > { %s3322_s3 = scalar_lea.hbm %s4169_s24, 128  ;;  %s3326_s17 = scalar_lea.hbm %s4283_s16, 256 }
 0xa5f   : > { %p3323_p9 = scmp.ne.s32.totalorder %s4169_s24, %s3322_s3  ;;  %p3327_p3 = scmp.lt.u32.totalorder %s4169_s24, %s4283_s16 }
 0xa60   : > { %p3328_p1 = scmp.lt.u32.totalorder %s3326_s17, %s3322_s3  ;;  %p3330_p11 = scmp.lt.u32.totalorder %s3322_s3, %s4169_s24 }
 0xa61   : > { %p3324_p4 = pnand %p3323_p9, %p4284_p0 }
 0xa62   : > { %p3329_p12 = por %p3328_p1, %p3327_p3 }
 0xa63   : > { %p3325_p6 = pneg %p3324_p4 }
 0xa64   : > { %p3331_p5 = por %p3330_p11, %p3329_p12 }
 0xa66   : > { %p3332_p7 = pnand %p3331_p5, %p3325_p6 }
 0xa68   : > { %3335 = shalt.err (!%p3332_p7)
}
 0xa69   : > { %2688 = dma.vmem_to_hbm [thread:$0]  (%p4284_p0), %s4171_s15, 128, %s4169_s24, %s2200_s25  }
 0xa6a PF: > { %s4285_s29 = sld [smem:[#allocation39_spill]]  ;;  %p4286_p10 = scmp.ne.s32.totalorder %s4274_s19, 0 }
 0xa6b   : > { %p4287_p13 = scmp.ge.s32.totalorder %s3418_s23, 2 }
 0xa6d   : > { %p2738_p2 = pnand %p4287_p13, %p4286_p10 }
 0xa70   : > { %s2225_s20 = sand.u32 1, %s4285_s29  }
 0xa71   : > { %s2226_s2 = scalar_lea.sflag [#allocation7], %s2225_s20 }
 0xa72   : > { %3393 = dma.done.wait (!%p2738_p2), %s2226_s2, 128  }
 0xa73   : > { %3395 = vsyncadd (!%p2738_p2), %s2226_s2, 4294967168  ;;  %s38_s23 = sadd.s32 1, %s3418_s23   ;;  %s4288_s18 = sld [smem:[#allocation40_spill]] }
 0xa74   : > { %p35_p8 = scmp.ge.s32.totalorder %s38_s23, 4   ;;  %s4289_s19 = sld [smem:[#allocation41_spill]] }
 0xa75   : > { %s4290_s20 = smov %s3893_s28  ;;  %s4291_s21 = smov %s3414_s22 }
 0xa76   : > { %s4292_s22 = smov %s4294_s30  ;;  %37 = sbr.rel (!%p35_p8) target bundleno = 19 (0x13), region = 187 }
 0xa7d   :  { %2231 = vsyncpa [#allocation6], 1 }
 0xa7e   :  { %2233 = vsyncpa [#allocation6 + $0x1], 1 }
 0xa7f   :  { %2234 = vsyncpa [#allocation9], 1 }
 0xa80   :  { %2235 = vsyncpa [#allocation12], 1 }
 0xa81   :  { %2236 = vsyncpa [#allocation15], 1 }
 0xa82   :  { %2237 = vsyncpa [#allocation18], 1 }
 0xa83   :  { %2238 = vsyncpa [#allocation21], 1 }
 0xa84   :  { %2239 = vsyncpa [#allocation24], 1 }
 0xa85   :  { %2240 = vsyncpa [#allocation27], 1 }
 0xa86   :  { %2241 = vsyncpa [#allocation7], 1 }
 0xa87   :  { %2243 = vsyncpa [#allocation7 + $0x1], 1 }

</bundles_post_ra>
